<compile_context>
chip_gen: v7x
topology: tpu7x:2x2x1
jax: 0.10.0
libtpu: 0.0.40
codegen_flags: <defaults>
</compile_context>

<pallas_src>
import math

import jax
import jax.numpy as jnp
from jax import lax
from jax.experimental import pallas as pl
from jax.experimental.pallas import tpu as pltpu

# Model dims (small stand-in for the HF encoder).
B, S, H, FFN, VOCAB, NUM_LABELS = 2, 8, 32, 64, 100, 4
BS = B * S
HP = 128                  # hidden / vocab / FFN / labels all padded to one 128-lane vreg
CLS_BLOCK = 8             # sublane-aligned row block holding the B CLS-logit rows
OUT_ROWS = 2 * CLS_BLOCK  # rows [0:8) = CLS logits, rows [8:16) = broadcast loss
NEG_INF = -1e9            # f32-safe large negative for masked scores

# row-block index of each weight matrix inside the packed (8*HP, HP) slab
W_EMB, W_Q, W_K, W_V, W_O, W_1, W_2, W_C = range(8)

assert VOCAB <= HP and H <= HP and FFN <= HP and NUM_LABELS <= HP
assert B <= CLS_BLOCK


def _layer_norm(x, gamma, beta, n_valid, eps=1e-12):
    # x is zero-padded beyond the n_valid leading lanes: use sum/n statistics so
    # padding does not bias mean/var; E[x^2]-mean^2 keeps padded lanes out of the
    # variance, and zero-padded gamma/beta keep padded lanes at exactly 0.
    mean = jnp.sum(x, axis=-1, keepdims=True) / n_valid
    var = jnp.sum(x * x, axis=-1, keepdims=True) / n_valid - mean * mean
    return (x - mean) * lax.rsqrt(var + eps) * gamma + beta


def _gelu_tanh(x):
    c = math.sqrt(2.0 / math.pi)
    return 0.5 * x * (1.0 + jnp.tanh(c * (x + 0.044715 * x * x * x)))


def encoder_cls_kernel(ids_ref, w_ref, vec_ref, mask_ref, labels_ref, out_ref):
    f32, bf16 = jnp.float32, jnp.bfloat16

    def wslab(i):                       # 128x128 static, lane/sublane-aligned view
        return w_ref[i * HP:(i + 1) * HP, :]

    def mxu(a, b):                      # bf16 MXU operands, f32 accumulation
        return jnp.dot(a.astype(bf16), b, preferred_element_type=f32)

    vp = vec_ref[...]                   # (16,128) f32 bias / LN slab (static)
    b_q, b_k, b_v = vp[0:1, :], vp[1:2, :], vp[2:3, :]
    b_o = vp[3:4, :]
    g1, be1 = vp[4:5, :], vp[5:6, :]
    b_1, b_2 = vp[6:7, :], vp[7:8, :]
    g2, be2 = vp[8:9, :], vp[9:10, :]
    b_c = vp[10:11, :]

    # ---- embedding gather as a one-hot MXU matmul (no XLA gather round-trip) ----
    ids = ids_ref[...]                                              # (BS,1) int32
    vocab_iota = lax.broadcasted_iota(jnp.int32, (BS, HP), 1)
    onehot_ids = (vocab_iota == ids).astype(bf16)                   # (BS,128)
    x = jnp.dot(onehot_ids, wslab(W_EMB), preferred_element_type=f32)   # (BS,128) f32

    # ---- single-head self-attention as flat 2-D MXU matmuls ----
    q = mxu(x, wslab(W_Q)) + b_q        # Wq / bq pre-scaled by 1/sqrt(H)
    k = mxu(x, wslab(W_K)) + b_k
    v = mxu(x, wslab(W_V)) + b_v

    # (BS,BS) scores: contract the padded hidden lanes (zero padding adds 0)
    scores = lax.dot_general(q.astype(bf16), k.astype(bf16),
                             (((1,), (1,)), ((), ())),
                             preferred_element_type=f32)            # (BS,BS) f32

    # additive mask: same-sequence block diagonal AND key not padded.
    # attention_mask lives in SMEM; build the bias with iota compares + selects.
    row_i = lax.broadcasted_iota(jnp.int32, (BS, BS), 0)
    col_i = lax.broadcasted_iota(jnp.int32, (BS, BS), 1)
    bias = jnp.full((BS, BS), NEG_INF, f32)
    for b in range(B):
        for s in range(S):
            key_bias = (1 - mask_ref[b, s]).astype(f32) * NEG_INF   # scalar 0 / -1e9
            in_block = ((col_i == b * S + s) &
                        (row_i >= b * S) & (row_i < (b + 1) * S))
            bias = jnp.where(in_block, key_bias, bias)
    scores = scores + bias                                          # mask add in f32

    m = jnp.max(scores, axis=-1, keepdims=True)
    e = jnp.exp(scores - m)                                         # f32 softmax
    attn = e * pl.reciprocal(jnp.sum(e, axis=-1, keepdims=True), approx=True)

    ctx = jnp.dot(attn.astype(bf16), v.astype(bf16),
                  preferred_element_type=f32)                       # (BS,128)
    attn_out = mxu(ctx, wslab(W_O)) + b_o
    h1 = _layer_norm(x + attn_out, g1, be1, float(H))

    # ---- feed-forward ----
    ff = _gelu_tanh(mxu(h1, wslab(W_1)) + b_1)
    ff = mxu(ff, wslab(W_2)) + b_2
    h2 = _layer_norm(h1 + ff, g2, be2, float(H))

    # ---- classifier on CLS rows only (one-hot row-select matmul, no relayouts) ----
    sel = (lax.broadcasted_iota(jnp.int32, (CLS_BLOCK, BS), 1) ==
           lax.broadcasted_iota(jnp.int32, (CLS_BLOCK, BS), 0) * S).astype(bf16)
    h2_cls = jnp.dot(sel, h2.astype(bf16), preferred_element_type=f32)    # (8,128)
    logits_cls = mxu(h2_cls, wslab(W_C)) + b_c                            # (8,128)
    out_ref[0:CLS_BLOCK, :] = logits_cls       # lane-dense, sublane-aligned store

    # ---- cross-entropy over the B real CLS rows (all f32) ----
    lane = lax.broadcasted_iota(jnp.int32, (CLS_BLOCK, HP), 1)
    masked_logits = jnp.where(lane < NUM_LABELS, logits_cls, NEG_INF)
    lmax = jnp.max(masked_logits, axis=-1, keepdims=True)
    shifted = masked_logits - lmax
    lse = jnp.log(jnp.sum(jnp.exp(shifted), axis=-1, keepdims=True))

    row = lax.broadcasted_iota(jnp.int32, (CLS_BLOCK, 1), 0)
    lab = jnp.full((CLS_BLOCK, 1), -1, jnp.int32)     # rows >= B select no label
    for b in range(B):
        lab = jnp.where(row == b, labels_ref[b], lab)
    onehot_lab = (lane == lab).astype(f32)            # (8,128), zero on padded rows

    nll = -jnp.sum(onehot_lab * (shifted - lse), axis=-1, keepdims=True)  # (8,1)
    loss = jnp.sum(nll, axis=0, keepdims=True) * (1.0 / B)                # (1,1)
    out_ref[CLS_BLOCK:OUT_ROWS, :] = jnp.broadcast_to(loss, (CLS_BLOCK, HP))


def pack_params(params):
    """One-time static packing (hoisted out of the per-call path)."""
    scale = 1.0 / math.sqrt(H)

    def pad(w):
        out = jnp.zeros((HP, HP), jnp.float32)
        return out.at[: w.shape[0], : w.shape[1]].set(w)

    w_all = jnp.concatenate([
        pad(params["emb"]),            # W_EMB
        pad(params["wq"] * scale),     # W_Q  (1/sqrt(H) folded in)
        pad(params["wk"]),             # W_K
        pad(params["wv"]),             # W_V
        pad(params["wo"]),             # W_O
        pad(params["w1"]),             # W_1
        pad(params["w2"]),             # W_2
        pad(params["wc"]),             # W_C
    ], axis=0).astype(jnp.bfloat16)    # (1024,128) bf16: MXU-native, single DMA

    vec = jnp.zeros((16, HP), jnp.float32)
    vec = vec.at[0, :H].set(params["bq"][0] * scale)
    vec = vec.at[1, :H].set(params["bk"][0])
    vec = vec.at[2, :H].set(params["bv"][0])
    vec = vec.at[3, :H].set(params["bo"][0])
    vec = vec.at[4, :H].set(params["ln1_g"][0])
    vec = vec.at[5, :H].set(params["ln1_b"][0])
    vec = vec.at[6, :FFN].set(params["b1"][0])
    vec = vec.at[7, :H].set(params["b2"][0])
    vec = vec.at[8, :H].set(params["ln2_g"][0])
    vec = vec.at[9, :H].set(params["ln2_b"][0])
    vec = vec.at[10, :NUM_LABELS].set(params["bc"][0])
    return w_all, vec


@jax.jit
def custom_model_forward(w_all, vec, input_ids, attention_mask, labels):
    """(loss, logits) = CustomModel(input_ids, attention_mask, labels)."""
    ids_col = input_ids.reshape(BS, 1).astype(jnp.int32)   # lane-friendly id column
    mask_i32 = attention_mask.astype(jnp.int32)            # -> SMEM scalars
    labels_i32 = labels.astype(jnp.int32)                  # -> SMEM scalars

    vmem = pl.BlockSpec(memory_space=pltpu.MemorySpace.VMEM)
    smem = pl.BlockSpec(memory_space=pltpu.MemorySpace.SMEM)

    # TODO(synk): add a batch grid axis with dimension_semantics=("parallel",)
    # (v7x megacore) only once B*S reaches a few thousand rows; at B*S=16 the
    # single-program form avoids per-grid-step and cross-core overhead.
    out = pl.pallas_call(
        encoder_cls_kernel,
        out_shape=jax.ShapeDtypeStruct((OUT_ROWS, HP), jnp.float32),
        in_specs=[vmem, vmem, vmem, smem, smem],
        out_specs=vmem,
    )(ids_col, w_all, vec, mask_i32, labels_i32)

    logits = out[:B, :NUM_LABELS]     # CLS logits
    loss = out[CLS_BLOCK, 0]          # scalar CE loss
    return loss, logits


def init_params(key):
    ks = jax.random.split(key, 10)
    s = 0.02
    one_h = jnp.ones((1, H), jnp.float32)
    zero_h = jnp.zeros((1, H), jnp.float32)
    return {
        "emb": s * jax.random.normal(ks[0], (VOCAB, H), jnp.float32),
        "wq": s * jax.random.normal(ks[1], (H, H), jnp.float32), "bq": zero_h,
        "wk": s * jax.random.normal(ks[2], (H, H), jnp.float32), "bk": zero_h,
        "wv": s * jax.random.normal(ks[3], (H, H), jnp.float32), "bv": zero_h,
        "wo": s * jax.random.normal(ks[4], (H, H), jnp.float32), "bo": zero_h,
        "ln1_g": one_h, "ln1_b": zero_h,
        "w1": s * jax.random.normal(ks[5], (H, FFN), jnp.float32),
        "b1": jnp.zeros((1, FFN), jnp.float32),
        "w2": s * jax.random.normal(ks[6], (FFN, H), jnp.float32), "b2": zero_h,
        "ln2_g": one_h, "ln2_b": zero_h,
        "wc": s * jax.random.normal(ks[7], (H, NUM_LABELS), jnp.float32),
        "bc": jnp.zeros((1, NUM_LABELS), jnp.float32),
    }


if __name__ == "__main__":
    key = jax.random.PRNGKey(0)
    kp, ki, kl = jax.random.split(key, 3)

    params = init_params(kp)
    w_all, vec = pack_params(params)     # static packing done ONCE, outside the call path

    input_ids = jax.random.randint(ki, (B, S), 0, VOCAB, dtype=jnp.int32)
    attention_mask = jnp.concatenate(
        [jnp.ones((B, S - 2), jnp.int32), jnp.zeros((B, 2), jnp.int32)], axis=-1)
    labels = jax.random.randint(kl, (B,), 0, NUM_LABELS, dtype=jnp.int32)

    loss, logits = custom_model_forward(w_all, vec, input_ids, attention_mask, labels)
    jax.block_until_ready((loss, logits))

    assert logits.shape == (B, NUM_LABELS)
    assert loss.shape == ()
    assert bool(jnp.isfinite(loss)) and bool(jnp.all(jnp.isfinite(logits)))
    print("KERNEL_OK")
</pallas_src>

<mosaic_0001>
module attributes {stable_mosaic.version = 11 : i64} {
  func.func @encoder_cls_kernel(%arg0: memref<16x1xi32, #tpu.memory_space<vmem>>, %arg1: memref<1024x128xbf16, #tpu.memory_space<vmem>>, %arg2: memref<16x128xf32, #tpu.memory_space<vmem>>, %arg3: memref<2x8xi32, #tpu.memory_space<smem>>, %arg4: memref<2xi32, #tpu.memory_space<smem>>, %arg5: memref<16x128xf32, #tpu.memory_space<vmem>>) attributes {dimension_semantics = [], scalar_prefetch = 0 : i64, scratch_operands = 0 : i64, tpu.core_type = #tpu.core_type<tc>} {
    %c0 = arith.constant 0 : index
    %c0_0 = arith.constant 0 : index
    %0 = vector.load %arg2[%c0, %c0_0] : memref<16x128xf32, #tpu.memory_space<vmem>>, vector<16x128xf32>
    %1 = vector.extract_strided_slice %0 {offsets = [0, 0], sizes = [1, 128], strides = [1, 1]} : vector<16x128xf32> to vector<1x128xf32>
    %2 = vector.extract_strided_slice %0 {offsets = [1, 0], sizes = [1, 128], strides = [1, 1]} : vector<16x128xf32> to vector<1x128xf32>
    %3 = vector.extract_strided_slice %0 {offsets = [2, 0], sizes = [1, 128], strides = [1, 1]} : vector<16x128xf32> to vector<1x128xf32>
    %4 = vector.extract_strided_slice %0 {offsets = [3, 0], sizes = [1, 128], strides = [1, 1]} : vector<16x128xf32> to vector<1x128xf32>
    %5 = vector.extract_strided_slice %0 {offsets = [4, 0], sizes = [1, 128], strides = [1, 1]} : vector<16x128xf32> to vector<1x128xf32>
    %6 = vector.extract_strided_slice %0 {offsets = [5, 0], sizes = [1, 128], strides = [1, 1]} : vector<16x128xf32> to vector<1x128xf32>
    %7 = vector.extract_strided_slice %0 {offsets = [6, 0], sizes = [1, 128], strides = [1, 1]} : vector<16x128xf32> to vector<1x128xf32>
    %8 = vector.extract_strided_slice %0 {offsets = [7, 0], sizes = [1, 128], strides = [1, 1]} : vector<16x128xf32> to vector<1x128xf32>
    %9 = vector.extract_strided_slice %0 {offsets = [8, 0], sizes = [1, 128], strides = [1, 1]} : vector<16x128xf32> to vector<1x128xf32>
    %10 = vector.extract_strided_slice %0 {offsets = [9, 0], sizes = [1, 128], strides = [1, 1]} : vector<16x128xf32> to vector<1x128xf32>
    %11 = vector.extract_strided_slice %0 {offsets = [10, 0], sizes = [1, 128], strides = [1, 1]} : vector<16x128xf32> to vector<1x128xf32>
    %c0_1 = arith.constant 0 : index
    %c0_2 = arith.constant 0 : index
    %12 = vector.load %arg0[%c0_1, %c0_2] : memref<16x1xi32, #tpu.memory_space<vmem>>, vector<16x1xi32>
    %13 = tpu.iota {dimensions = array<i32: 1>} : vector<16x128xi32>
    %14 = vector.broadcast %12 : vector<16x1xi32> to vector<16x128xi32>
    %15 = arith.cmpi eq, %13, %14 : vector<16x128xi32>
    %16 = arith.extui %15 : vector<16x128xi1> to vector<16x128xi32>
    %17 = arith.sitofp %16 : vector<16x128xi32> to vector<16x128xf32>
    %18 = arith.truncf %17 : vector<16x128xf32> to vector<16x128xbf16>
    %c0_3 = arith.constant 0 : index
    %c0_4 = arith.constant 0 : index
    %19 = vector.load %arg1[%c0_3, %c0_4] : memref<1024x128xbf16, #tpu.memory_space<vmem>>, vector<128x128xbf16>
    %cst = arith.constant dense<0.000000e+00> : vector<16x128xf32>
    %20 = tpu.matmul %18, %19, %cst {dimension_numbers = #tpu.dot_dimension_numbers<[1], [0], [0], [1], [0, 0, 1, 1], [], []>} : vector<16x128xbf16>, vector<128x128xbf16>, vector<16x128xf32> -> vector<16x128xf32>
    %c128 = arith.constant 128 : index
    %c0_5 = arith.constant 0 : index
    %21 = vector.load %arg1[%c128, %c0_5] : memref<1024x128xbf16, #tpu.memory_space<vmem>>, vector<128x128xbf16>
    %22 = arith.truncf %20 : vector<16x128xf32> to vector<16x128xbf16>
    %cst_6 = arith.constant dense<0.000000e+00> : vector<16x128xf32>
    %23 = tpu.matmul %22, %21, %cst_6 {dimension_numbers = #tpu.dot_dimension_numbers<[1], [0], [0], [1], [0, 0, 1, 1], [], []>} : vector<16x128xbf16>, vector<128x128xbf16>, vector<16x128xf32> -> vector<16x128xf32>
    %24 = vector.broadcast %1 : vector<1x128xf32> to vector<16x128xf32>
    %25 = arith.addf %23, %24 : vector<16x128xf32>
    %c256 = arith.constant 256 : index
    %c0_7 = arith.constant 0 : index
    %26 = vector.load %arg1[%c256, %c0_7] : memref<1024x128xbf16, #tpu.memory_space<vmem>>, vector<128x128xbf16>
    %27 = arith.truncf %20 : vector<16x128xf32> to vector<16x128xbf16>
    %cst_8 = arith.constant dense<0.000000e+00> : vector<16x128xf32>
    %28 = tpu.matmul %27, %26, %cst_8 {dimension_numbers = #tpu.dot_dimension_numbers<[1], [0], [0], [1], [0, 0, 1, 1], [], []>} : vector<16x128xbf16>, vector<128x128xbf16>, vector<16x128xf32> -> vector<16x128xf32>
    %29 = vector.broadcast %2 : vector<1x128xf32> to vector<16x128xf32>
    %30 = arith.addf %28, %29 : vector<16x128xf32>
    %c384 = arith.constant 384 : index
    %c0_9 = arith.constant 0 : index
    %31 = vector.load %arg1[%c384, %c0_9] : memref<1024x128xbf16, #tpu.memory_space<vmem>>, vector<128x128xbf16>
    %32 = arith.truncf %20 : vector<16x128xf32> to vector<16x128xbf16>
    %cst_10 = arith.constant dense<0.000000e+00> : vector<16x128xf32>
    %33 = tpu.matmul %32, %31, %cst_10 {dimension_numbers = #tpu.dot_dimension_numbers<[1], [0], [0], [1], [0, 0, 1, 1], [], []>} : vector<16x128xbf16>, vector<128x128xbf16>, vector<16x128xf32> -> vector<16x128xf32>
    %34 = vector.broadcast %3 : vector<1x128xf32> to vector<16x128xf32>
    %35 = arith.addf %33, %34 : vector<16x128xf32>
    %36 = arith.truncf %25 : vector<16x128xf32> to vector<16x128xbf16>
    %37 = arith.truncf %30 : vector<16x128xf32> to vector<16x128xbf16>
    %cst_11 = arith.constant dense<0.000000e+00> : vector<16x16xf32>
    %38 = tpu.matmul %36, %37, %cst_11 {dimension_numbers = #tpu.dot_dimension_numbers<[1], [1], [0], [0], [0, 0, 1, 0], [], []>} : vector<16x128xbf16>, vector<16x128xbf16>, vector<16x16xf32> -> vector<16x16xf32>
    %39 = tpu.iota {dimensions = array<i32: 0>} : vector<16x16xi32>
    %40 = tpu.iota {dimensions = array<i32: 1>} : vector<16x16xi32>
    %cst_12 = arith.constant -1.000000e+09 : f32
    %41 = vector.broadcast %cst_12 : f32 to vector<16x16xf32>
    %c0_13 = arith.constant 0 : index
    %c0_14 = arith.constant 0 : index
    %42 = memref.load %arg3[%c0_13, %c0_14] : memref<2x8xi32, #tpu.memory_space<smem>>
    %c1_i32 = arith.constant 1 : i32
    %43 = arith.subi %c1_i32, %42 : i32
    %44 = arith.sitofp %43 : i32 to f32
    %cst_15 = arith.constant -1.000000e+09 : f32
    %45 = arith.mulf %44, %cst_15 : f32
    %c0_i32 = arith.constant 0 : i32
    %46 = vector.broadcast %c0_i32 : i32 to vector<16x16xi32>
    %47 = arith.cmpi eq, %40, %46 : vector<16x16xi32>
    %c0_i32_16 = arith.constant 0 : i32
    %48 = vector.broadcast %c0_i32_16 : i32 to vector<16x16xi32>
    %49 = arith.cmpi sge, %39, %48 : vector<16x16xi32>
    %50 = arith.andi %47, %49 : vector<16x16xi1>
    %c8_i32 = arith.constant 8 : i32
    %51 = vector.broadcast %c8_i32 : i32 to vector<16x16xi32>
    %52 = arith.cmpi slt, %39, %51 : vector<16x16xi32>
    %53 = arith.andi %50, %52 : vector<16x16xi1>
    %54 = vector.broadcast %45 : f32 to vector<16x16xf32>
    %55 = arith.select %53, %54, %41 : vector<16x16xi1>, vector<16x16xf32>
    %c0_17 = arith.constant 0 : index
    %c1 = arith.constant 1 : index
    %56 = memref.load %arg3[%c0_17, %c1] : memref<2x8xi32, #tpu.memory_space<smem>>
    %c1_i32_18 = arith.constant 1 : i32
    %57 = arith.subi %c1_i32_18, %56 : i32
    %58 = arith.sitofp %57 : i32 to f32
    %cst_19 = arith.constant -1.000000e+09 : f32
    %59 = arith.mulf %58, %cst_19 : f32
    %c1_i32_20 = arith.constant 1 : i32
    %60 = vector.broadcast %c1_i32_20 : i32 to vector<16x16xi32>
    %61 = arith.cmpi eq, %40, %60 : vector<16x16xi32>
    %c0_i32_21 = arith.constant 0 : i32
    %62 = vector.broadcast %c0_i32_21 : i32 to vector<16x16xi32>
    %63 = arith.cmpi sge, %39, %62 : vector<16x16xi32>
    %64 = arith.andi %61, %63 : vector<16x16xi1>
    %c8_i32_22 = arith.constant 8 : i32
    %65 = vector.broadcast %c8_i32_22 : i32 to vector<16x16xi32>
    %66 = arith.cmpi slt, %39, %65 : vector<16x16xi32>
    %67 = arith.andi %64, %66 : vector<16x16xi1>
    %68 = vector.broadcast %59 : f32 to vector<16x16xf32>
    %69 = arith.select %67, %68, %55 : vector<16x16xi1>, vector<16x16xf32>
    %c0_23 = arith.constant 0 : index
    %c2 = arith.constant 2 : index
    %70 = memref.load %arg3[%c0_23, %c2] : memref<2x8xi32, #tpu.memory_space<smem>>
    %c1_i32_24 = arith.constant 1 : i32
    %71 = arith.subi %c1_i32_24, %70 : i32
    %72 = arith.sitofp %71 : i32 to f32
    %cst_25 = arith.constant -1.000000e+09 : f32
    %73 = arith.mulf %72, %cst_25 : f32
    %c2_i32 = arith.constant 2 : i32
    %74 = vector.broadcast %c2_i32 : i32 to vector<16x16xi32>
    %75 = arith.cmpi eq, %40, %74 : vector<16x16xi32>
    %c0_i32_26 = arith.constant 0 : i32
    %76 = vector.broadcast %c0_i32_26 : i32 to vector<16x16xi32>
    %77 = arith.cmpi sge, %39, %76 : vector<16x16xi32>
    %78 = arith.andi %75, %77 : vector<16x16xi1>
    %c8_i32_27 = arith.constant 8 : i32
    %79 = vector.broadcast %c8_i32_27 : i32 to vector<16x16xi32>
    %80 = arith.cmpi slt, %39, %79 : vector<16x16xi32>
    %81 = arith.andi %78, %80 : vector<16x16xi1>
    %82 = vector.broadcast %73 : f32 to vector<16x16xf32>
    %83 = arith.select %81, %82, %69 : vector<16x16xi1>, vector<16x16xf32>
    %c0_28 = arith.constant 0 : index
    %c3 = arith.constant 3 : index
    %84 = memref.load %arg3[%c0_28, %c3] : memref<2x8xi32, #tpu.memory_space<smem>>
    %c1_i32_29 = arith.constant 1 : i32
    %85 = arith.subi %c1_i32_29, %84 : i32
    %86 = arith.sitofp %85 : i32 to f32
    %cst_30 = arith.constant -1.000000e+09 : f32
    %87 = arith.mulf %86, %cst_30 : f32
    %c3_i32 = arith.constant 3 : i32
    %88 = vector.broadcast %c3_i32 : i32 to vector<16x16xi32>
    %89 = arith.cmpi eq, %40, %88 : vector<16x16xi32>
    %c0_i32_31 = arith.constant 0 : i32
    %90 = vector.broadcast %c0_i32_31 : i32 to vector<16x16xi32>
    %91 = arith.cmpi sge, %39, %90 : vector<16x16xi32>
    %92 = arith.andi %89, %91 : vector<16x16xi1>
    %c8_i32_32 = arith.constant 8 : i32
    %93 = vector.broadcast %c8_i32_32 : i32 to vector<16x16xi32>
    %94 = arith.cmpi slt, %39, %93 : vector<16x16xi32>
    %95 = arith.andi %92, %94 : vector<16x16xi1>
    %96 = vector.broadcast %87 : f32 to vector<16x16xf32>
    %97 = arith.select %95, %96, %83 : vector<16x16xi1>, vector<16x16xf32>
    %c0_33 = arith.constant 0 : index
    %c4 = arith.constant 4 : index
    %98 = memref.load %arg3[%c0_33, %c4] : memref<2x8xi32, #tpu.memory_space<smem>>
    %c1_i32_34 = arith.constant 1 : i32
    %99 = arith.subi %c1_i32_34, %98 : i32
    %100 = arith.sitofp %99 : i32 to f32
    %cst_35 = arith.constant -1.000000e+09 : f32
    %101 = arith.mulf %100, %cst_35 : f32
    %c4_i32 = arith.constant 4 : i32
    %102 = vector.broadcast %c4_i32 : i32 to vector<16x16xi32>
    %103 = arith.cmpi eq, %40, %102 : vector<16x16xi32>
    %c0_i32_36 = arith.constant 0 : i32
    %104 = vector.broadcast %c0_i32_36 : i32 to vector<16x16xi32>
    %105 = arith.cmpi sge, %39, %104 : vector<16x16xi32>
    %106 = arith.andi %103, %105 : vector<16x16xi1>
    %c8_i32_37 = arith.constant 8 : i32
    %107 = vector.broadcast %c8_i32_37 : i32 to vector<16x16xi32>
    %108 = arith.cmpi slt, %39, %107 : vector<16x16xi32>
    %109 = arith.andi %106, %108 : vector<16x16xi1>
    %110 = vector.broadcast %101 : f32 to vector<16x16xf32>
    %111 = arith.select %109, %110, %97 : vector<16x16xi1>, vector<16x16xf32>
    %c0_38 = arith.constant 0 : index
    %c5 = arith.constant 5 : index
    %112 = memref.load %arg3[%c0_38, %c5] : memref<2x8xi32, #tpu.memory_space<smem>>
    %c1_i32_39 = arith.constant 1 : i32
    %113 = arith.subi %c1_i32_39, %112 : i32
    %114 = arith.sitofp %113 : i32 to f32
    %cst_40 = arith.constant -1.000000e+09 : f32
    %115 = arith.mulf %114, %cst_40 : f32
    %c5_i32 = arith.constant 5 : i32
    %116 = vector.broadcast %c5_i32 : i32 to vector<16x16xi32>
    %117 = arith.cmpi eq, %40, %116 : vector<16x16xi32>
    %c0_i32_41 = arith.constant 0 : i32
    %118 = vector.broadcast %c0_i32_41 : i32 to vector<16x16xi32>
    %119 = arith.cmpi sge, %39, %118 : vector<16x16xi32>
    %120 = arith.andi %117, %119 : vector<16x16xi1>
    %c8_i32_42 = arith.constant 8 : i32
    %121 = vector.broadcast %c8_i32_42 : i32 to vector<16x16xi32>
    %122 = arith.cmpi slt, %39, %121 : vector<16x16xi32>
    %123 = arith.andi %120, %122 : vector<16x16xi1>
    %124 = vector.broadcast %115 : f32 to vector<16x16xf32>
    %125 = arith.select %123, %124, %111 : vector<16x16xi1>, vector<16x16xf32>
    %c0_43 = arith.constant 0 : index
    %c6 = arith.constant 6 : index
    %126 = memref.load %arg3[%c0_43, %c6] : memref<2x8xi32, #tpu.memory_space<smem>>
    %c1_i32_44 = arith.constant 1 : i32
    %127 = arith.subi %c1_i32_44, %126 : i32
    %128 = arith.sitofp %127 : i32 to f32
    %cst_45 = arith.constant -1.000000e+09 : f32
    %129 = arith.mulf %128, %cst_45 : f32
    %c6_i32 = arith.constant 6 : i32
    %130 = vector.broadcast %c6_i32 : i32 to vector<16x16xi32>
    %131 = arith.cmpi eq, %40, %130 : vector<16x16xi32>
    %c0_i32_46 = arith.constant 0 : i32
    %132 = vector.broadcast %c0_i32_46 : i32 to vector<16x16xi32>
    %133 = arith.cmpi sge, %39, %132 : vector<16x16xi32>
    %134 = arith.andi %131, %133 : vector<16x16xi1>
    %c8_i32_47 = arith.constant 8 : i32
    %135 = vector.broadcast %c8_i32_47 : i32 to vector<16x16xi32>
    %136 = arith.cmpi slt, %39, %135 : vector<16x16xi32>
    %137 = arith.andi %134, %136 : vector<16x16xi1>
    %138 = vector.broadcast %129 : f32 to vector<16x16xf32>
    %139 = arith.select %137, %138, %125 : vector<16x16xi1>, vector<16x16xf32>
    %c0_48 = arith.constant 0 : index
    %c7 = arith.constant 7 : index
    %140 = memref.load %arg3[%c0_48, %c7] : memref<2x8xi32, #tpu.memory_space<smem>>
    %c1_i32_49 = arith.constant 1 : i32
    %141 = arith.subi %c1_i32_49, %140 : i32
    %142 = arith.sitofp %141 : i32 to f32
    %cst_50 = arith.constant -1.000000e+09 : f32
    %143 = arith.mulf %142, %cst_50 : f32
    %c7_i32 = arith.constant 7 : i32
    %144 = vector.broadcast %c7_i32 : i32 to vector<16x16xi32>
    %145 = arith.cmpi eq, %40, %144 : vector<16x16xi32>
    %c0_i32_51 = arith.constant 0 : i32
    %146 = vector.broadcast %c0_i32_51 : i32 to vector<16x16xi32>
    %147 = arith.cmpi sge, %39, %146 : vector<16x16xi32>
    %148 = arith.andi %145, %147 : vector<16x16xi1>
    %c8_i32_52 = arith.constant 8 : i32
    %149 = vector.broadcast %c8_i32_52 : i32 to vector<16x16xi32>
    %150 = arith.cmpi slt, %39, %149 : vector<16x16xi32>
    %151 = arith.andi %148, %150 : vector<16x16xi1>
    %152 = vector.broadcast %143 : f32 to vector<16x16xf32>
    %153 = arith.select %151, %152, %139 : vector<16x16xi1>, vector<16x16xf32>
    %c1_53 = arith.constant 1 : index
    %c0_54 = arith.constant 0 : index
    %154 = memref.load %arg3[%c1_53, %c0_54] : memref<2x8xi32, #tpu.memory_space<smem>>
    %c1_i32_55 = arith.constant 1 : i32
    %155 = arith.subi %c1_i32_55, %154 : i32
    %156 = arith.sitofp %155 : i32 to f32
    %cst_56 = arith.constant -1.000000e+09 : f32
    %157 = arith.mulf %156, %cst_56 : f32
    %c8_i32_57 = arith.constant 8 : i32
    %158 = vector.broadcast %c8_i32_57 : i32 to vector<16x16xi32>
    %159 = arith.cmpi eq, %40, %158 : vector<16x16xi32>
    %c8_i32_58 = arith.constant 8 : i32
    %160 = vector.broadcast %c8_i32_58 : i32 to vector<16x16xi32>
    %161 = arith.cmpi sge, %39, %160 : vector<16x16xi32>
    %162 = arith.andi %159, %161 : vector<16x16xi1>
    %c16_i32 = arith.constant 16 : i32
    %163 = vector.broadcast %c16_i32 : i32 to vector<16x16xi32>
    %164 = arith.cmpi slt, %39, %163 : vector<16x16xi32>
    %165 = arith.andi %162, %164 : vector<16x16xi1>
    %166 = vector.broadcast %157 : f32 to vector<16x16xf32>
    %167 = arith.select %165, %166, %153 : vector<16x16xi1>, vector<16x16xf32>
    %c1_59 = arith.constant 1 : index
    %c1_60 = arith.constant 1 : index
    %168 = memref.load %arg3[%c1_59, %c1_60] : memref<2x8xi32, #tpu.memory_space<smem>>
    %c1_i32_61 = arith.constant 1 : i32
    %169 = arith.subi %c1_i32_61, %168 : i32
    %170 = arith.sitofp %169 : i32 to f32
    %cst_62 = arith.constant -1.000000e+09 : f32
    %171 = arith.mulf %170, %cst_62 : f32
    %c9_i32 = arith.constant 9 : i32
    %172 = vector.broadcast %c9_i32 : i32 to vector<16x16xi32>
    %173 = arith.cmpi eq, %40, %172 : vector<16x16xi32>
    %c8_i32_63 = arith.constant 8 : i32
    %174 = vector.broadcast %c8_i32_63 : i32 to vector<16x16xi32>
    %175 = arith.cmpi sge, %39, %174 : vector<16x16xi32>
    %176 = arith.andi %173, %175 : vector<16x16xi1>
    %c16_i32_64 = arith.constant 16 : i32
    %177 = vector.broadcast %c16_i32_64 : i32 to vector<16x16xi32>
    %178 = arith.cmpi slt, %39, %177 : vector<16x16xi32>
    %179 = arith.andi %176, %178 : vector<16x16xi1>
    %180 = vector.broadcast %171 : f32 to vector<16x16xf32>
    %181 = arith.select %179, %180, %167 : vector<16x16xi1>, vector<16x16xf32>
    %c1_65 = arith.constant 1 : index
    %c2_66 = arith.constant 2 : index
    %182 = memref.load %arg3[%c1_65, %c2_66] : memref<2x8xi32, #tpu.memory_space<smem>>
    %c1_i32_67 = arith.constant 1 : i32
    %183 = arith.subi %c1_i32_67, %182 : i32
    %184 = arith.sitofp %183 : i32 to f32
    %cst_68 = arith.constant -1.000000e+09 : f32
    %185 = arith.mulf %184, %cst_68 : f32
    %c10_i32 = arith.constant 10 : i32
    %186 = vector.broadcast %c10_i32 : i32 to vector<16x16xi32>
    %187 = arith.cmpi eq, %40, %186 : vector<16x16xi32>
    %c8_i32_69 = arith.constant 8 : i32
    %188 = vector.broadcast %c8_i32_69 : i32 to vector<16x16xi32>
    %189 = arith.cmpi sge, %39, %188 : vector<16x16xi32>
    %190 = arith.andi %187, %189 : vector<16x16xi1>
    %c16_i32_70 = arith.constant 16 : i32
    %191 = vector.broadcast %c16_i32_70 : i32 to vector<16x16xi32>
    %192 = arith.cmpi slt, %39, %191 : vector<16x16xi32>
    %193 = arith.andi %190, %192 : vector<16x16xi1>
    %194 = vector.broadcast %185 : f32 to vector<16x16xf32>
    %195 = arith.select %193, %194, %181 : vector<16x16xi1>, vector<16x16xf32>
    %c1_71 = arith.constant 1 : index
    %c3_72 = arith.constant 3 : index
    %196 = memref.load %arg3[%c1_71, %c3_72] : memref<2x8xi32, #tpu.memory_space<smem>>
    %c1_i32_73 = arith.constant 1 : i32
    %197 = arith.subi %c1_i32_73, %196 : i32
    %198 = arith.sitofp %197 : i32 to f32
    %cst_74 = arith.constant -1.000000e+09 : f32
    %199 = arith.mulf %198, %cst_74 : f32
    %c11_i32 = arith.constant 11 : i32
    %200 = vector.broadcast %c11_i32 : i32 to vector<16x16xi32>
    %201 = arith.cmpi eq, %40, %200 : vector<16x16xi32>
    %c8_i32_75 = arith.constant 8 : i32
    %202 = vector.broadcast %c8_i32_75 : i32 to vector<16x16xi32>
    %203 = arith.cmpi sge, %39, %202 : vector<16x16xi32>
    %204 = arith.andi %201, %203 : vector<16x16xi1>
    %c16_i32_76 = arith.constant 16 : i32
    %205 = vector.broadcast %c16_i32_76 : i32 to vector<16x16xi32>
    %206 = arith.cmpi slt, %39, %205 : vector<16x16xi32>
    %207 = arith.andi %204, %206 : vector<16x16xi1>
    %208 = vector.broadcast %199 : f32 to vector<16x16xf32>
    %209 = arith.select %207, %208, %195 : vector<16x16xi1>, vector<16x16xf32>
    %c1_77 = arith.constant 1 : index
    %c4_78 = arith.constant 4 : index
    %210 = memref.load %arg3[%c1_77, %c4_78] : memref<2x8xi32, #tpu.memory_space<smem>>
    %c1_i32_79 = arith.constant 1 : i32
    %211 = arith.subi %c1_i32_79, %210 : i32
    %212 = arith.sitofp %211 : i32 to f32
    %cst_80 = arith.constant -1.000000e+09 : f32
    %213 = arith.mulf %212, %cst_80 : f32
    %c12_i32 = arith.constant 12 : i32
    %214 = vector.broadcast %c12_i32 : i32 to vector<16x16xi32>
    %215 = arith.cmpi eq, %40, %214 : vector<16x16xi32>
    %c8_i32_81 = arith.constant 8 : i32
    %216 = vector.broadcast %c8_i32_81 : i32 to vector<16x16xi32>
    %217 = arith.cmpi sge, %39, %216 : vector<16x16xi32>
    %218 = arith.andi %215, %217 : vector<16x16xi1>
    %c16_i32_82 = arith.constant 16 : i32
    %219 = vector.broadcast %c16_i32_82 : i32 to vector<16x16xi32>
    %220 = arith.cmpi slt, %39, %219 : vector<16x16xi32>
    %221 = arith.andi %218, %220 : vector<16x16xi1>
    %222 = vector.broadcast %213 : f32 to vector<16x16xf32>
    %223 = arith.select %221, %222, %209 : vector<16x16xi1>, vector<16x16xf32>
    %c1_83 = arith.constant 1 : index
    %c5_84 = arith.constant 5 : index
    %224 = memref.load %arg3[%c1_83, %c5_84] : memref<2x8xi32, #tpu.memory_space<smem>>
    %c1_i32_85 = arith.constant 1 : i32
    %225 = arith.subi %c1_i32_85, %224 : i32
    %226 = arith.sitofp %225 : i32 to f32
    %cst_86 = arith.constant -1.000000e+09 : f32
    %227 = arith.mulf %226, %cst_86 : f32
    %c13_i32 = arith.constant 13 : i32
    %228 = vector.broadcast %c13_i32 : i32 to vector<16x16xi32>
    %229 = arith.cmpi eq, %40, %228 : vector<16x16xi32>
    %c8_i32_87 = arith.constant 8 : i32
    %230 = vector.broadcast %c8_i32_87 : i32 to vector<16x16xi32>
    %231 = arith.cmpi sge, %39, %230 : vector<16x16xi32>
    %232 = arith.andi %229, %231 : vector<16x16xi1>
    %c16_i32_88 = arith.constant 16 : i32
    %233 = vector.broadcast %c16_i32_88 : i32 to vector<16x16xi32>
    %234 = arith.cmpi slt, %39, %233 : vector<16x16xi32>
    %235 = arith.andi %232, %234 : vector<16x16xi1>
    %236 = vector.broadcast %227 : f32 to vector<16x16xf32>
    %237 = arith.select %235, %236, %223 : vector<16x16xi1>, vector<16x16xf32>
    %c1_89 = arith.constant 1 : index
    %c6_90 = arith.constant 6 : index
    %238 = memref.load %arg3[%c1_89, %c6_90] : memref<2x8xi32, #tpu.memory_space<smem>>
    %c1_i32_91 = arith.constant 1 : i32
    %239 = arith.subi %c1_i32_91, %238 : i32
    %240 = arith.sitofp %239 : i32 to f32
    %cst_92 = arith.constant -1.000000e+09 : f32
    %241 = arith.mulf %240, %cst_92 : f32
    %c14_i32 = arith.constant 14 : i32
    %242 = vector.broadcast %c14_i32 : i32 to vector<16x16xi32>
    %243 = arith.cmpi eq, %40, %242 : vector<16x16xi32>
    %c8_i32_93 = arith.constant 8 : i32
    %244 = vector.broadcast %c8_i32_93 : i32 to vector<16x16xi32>
    %245 = arith.cmpi sge, %39, %244 : vector<16x16xi32>
    %246 = arith.andi %243, %245 : vector<16x16xi1>
    %c16_i32_94 = arith.constant 16 : i32
    %247 = vector.broadcast %c16_i32_94 : i32 to vector<16x16xi32>
    %248 = arith.cmpi slt, %39, %247 : vector<16x16xi32>
    %249 = arith.andi %246, %248 : vector<16x16xi1>
    %250 = vector.broadcast %241 : f32 to vector<16x16xf32>
    %251 = arith.select %249, %250, %237 : vector<16x16xi1>, vector<16x16xf32>
    %c1_95 = arith.constant 1 : index
    %c7_96 = arith.constant 7 : index
    %252 = memref.load %arg3[%c1_95, %c7_96] : memref<2x8xi32, #tpu.memory_space<smem>>
    %c1_i32_97 = arith.constant 1 : i32
    %253 = arith.subi %c1_i32_97, %252 : i32
    %254 = arith.sitofp %253 : i32 to f32
    %cst_98 = arith.constant -1.000000e+09 : f32
    %255 = arith.mulf %254, %cst_98 : f32
    %c15_i32 = arith.constant 15 : i32
    %256 = vector.broadcast %c15_i32 : i32 to vector<16x16xi32>
    %257 = arith.cmpi eq, %40, %256 : vector<16x16xi32>
    %c8_i32_99 = arith.constant 8 : i32
    %258 = vector.broadcast %c8_i32_99 : i32 to vector<16x16xi32>
    %259 = arith.cmpi sge, %39, %258 : vector<16x16xi32>
    %260 = arith.andi %257, %259 : vector<16x16xi1>
    %c16_i32_100 = arith.constant 16 : i32
    %261 = vector.broadcast %c16_i32_100 : i32 to vector<16x16xi32>
    %262 = arith.cmpi slt, %39, %261 : vector<16x16xi32>
    %263 = arith.andi %260, %262 : vector<16x16xi1>
    %264 = vector.broadcast %255 : f32 to vector<16x16xf32>
    %265 = arith.select %263, %264, %251 : vector<16x16xi1>, vector<16x16xf32>
    %266 = arith.addf %38, %265 : vector<16x16xf32>
    %cst_101 = arith.constant dense<0xFF800000> : vector<16xf32>
    %267 = vector.multi_reduction <maximumf>, %266, %cst_101 [1] : vector<16x16xf32> to vector<16xf32>
    %268 = vector.shape_cast %267 : vector<16xf32> to vector<16x1xf32>
    %269 = vector.broadcast %268 : vector<16x1xf32> to vector<16x16xf32>
    %270 = arith.subf %266, %269 : vector<16x16xf32>
    %271 = math.exp %270 : vector<16x16xf32>
    %cst_102 = arith.constant dense<0.000000e+00> : vector<16xf32>
    %272 = vector.multi_reduction <add>, %271, %cst_102 [1] : vector<16x16xf32> to vector<16xf32>
    %273 = vector.shape_cast %272 : vector<16xf32> to vector<16x1xf32>
    %274 = tpu.reciprocal %273 {approx = true} : vector<16x1xf32> -> vector<16x1xf32>
    %275 = vector.broadcast %274 : vector<16x1xf32> to vector<16x16xf32>
    %276 = arith.mulf %271, %275 : vector<16x16xf32>
    %277 = arith.truncf %276 : vector<16x16xf32> to vector<16x16xbf16>
    %278 = arith.truncf %35 : vector<16x128xf32> to vector<16x128xbf16>
    %cst_103 = arith.constant dense<0.000000e+00> : vector<16x128xf32>
    %279 = tpu.matmul %277, %278, %cst_103 {dimension_numbers = #tpu.dot_dimension_numbers<[1], [0], [0], [1], [0, 0, 1, 1], [], []>} : vector<16x16xbf16>, vector<16x128xbf16>, vector<16x128xf32> -> vector<16x128xf32>
    %c512 = arith.constant 512 : index
    %c0_104 = arith.constant 0 : index
    %280 = vector.load %arg1[%c512, %c0_104] : memref<1024x128xbf16, #tpu.memory_space<vmem>>, vector<128x128xbf16>
    %281 = arith.truncf %279 : vector<16x128xf32> to vector<16x128xbf16>
    %cst_105 = arith.constant dense<0.000000e+00> : vector<16x128xf32>
    %282 = tpu.matmul %281, %280, %cst_105 {dimension_numbers = #tpu.dot_dimension_numbers<[1], [0], [0], [1], [0, 0, 1, 1], [], []>} : vector<16x128xbf16>, vector<128x128xbf16>, vector<16x128xf32> -> vector<16x128xf32>
    %283 = vector.broadcast %4 : vector<1x128xf32> to vector<16x128xf32>
    %284 = arith.addf %282, %283 : vector<16x128xf32>
    %285 = arith.addf %20, %284 : vector<16x128xf32>
    %cst_106 = arith.constant dense<0.000000e+00> : vector<16xf32>
    %286 = vector.multi_reduction <add>, %285, %cst_106 [1] : vector<16x128xf32> to vector<16xf32>
    %287 = vector.shape_cast %286 : vector<16xf32> to vector<16x1xf32>
    %cst_107 = arith.constant 3.200000e+01 : f32
    %288 = vector.broadcast %cst_107 : f32 to vector<16x1xf32>
    %289 = arith.divf %287, %288 : vector<16x1xf32>
    %290 = arith.mulf %285, %285 : vector<16x128xf32>
    %cst_108 = arith.constant dense<0.000000e+00> : vector<16xf32>
    %291 = vector.multi_reduction <add>, %290, %cst_108 [1] : vector<16x128xf32> to vector<16xf32>
    %292 = vector.shape_cast %291 : vector<16xf32> to vector<16x1xf32>
    %cst_109 = arith.constant 3.200000e+01 : f32
    %293 = vector.broadcast %cst_109 : f32 to vector<16x1xf32>
    %294 = arith.divf %292, %293 : vector<16x1xf32>
    %295 = arith.mulf %289, %289 : vector<16x1xf32>
    %296 = arith.subf %294, %295 : vector<16x1xf32>
    %297 = vector.broadcast %289 : vector<16x1xf32> to vector<16x128xf32>
    %298 = arith.subf %285, %297 : vector<16x128xf32>
    %cst_110 = arith.constant 9.99999996E-13 : f32
    %299 = vector.broadcast %cst_110 : f32 to vector<16x1xf32>
    %300 = arith.addf %296, %299 : vector<16x1xf32>
    %301 = math.rsqrt %300 : vector<16x1xf32>
    %302 = vector.broadcast %301 : vector<16x1xf32> to vector<16x128xf32>
    %303 = arith.mulf %298, %302 : vector<16x128xf32>
    %304 = vector.broadcast %5 : vector<1x128xf32> to vector<16x128xf32>
    %305 = arith.mulf %303, %304 : vector<16x128xf32>
    %306 = vector.broadcast %6 : vector<1x128xf32> to vector<16x128xf32>
    %307 = arith.addf %305, %306 : vector<16x128xf32>
    %c640 = arith.constant 640 : index
    %c0_111 = arith.constant 0 : index
    %308 = vector.load %arg1[%c640, %c0_111] : memref<1024x128xbf16, #tpu.memory_space<vmem>>, vector<128x128xbf16>
    %309 = arith.truncf %307 : vector<16x128xf32> to vector<16x128xbf16>
    %cst_112 = arith.constant dense<0.000000e+00> : vector<16x128xf32>
    %310 = tpu.matmul %309, %308, %cst_112 {dimension_numbers = #tpu.dot_dimension_numbers<[1], [0], [0], [1], [0, 0, 1, 1], [], []>} : vector<16x128xbf16>, vector<128x128xbf16>, vector<16x128xf32> -> vector<16x128xf32>
    %311 = vector.broadcast %7 : vector<1x128xf32> to vector<16x128xf32>
    %312 = arith.addf %310, %311 : vector<16x128xf32>
    %cst_113 = arith.constant 5.000000e-01 : f32
    %313 = vector.broadcast %cst_113 : f32 to vector<16x128xf32>
    %314 = arith.mulf %313, %312 : vector<16x128xf32>
    %cst_114 = arith.constant 4.471500e-02 : f32
    %315 = vector.broadcast %cst_114 : f32 to vector<16x128xf32>
    %316 = arith.mulf %315, %312 : vector<16x128xf32>
    %317 = arith.mulf %316, %312 : vector<16x128xf32>
    %318 = arith.mulf %317, %312 : vector<16x128xf32>
    %319 = arith.addf %312, %318 : vector<16x128xf32>
    %cst_115 = arith.constant 0.797884583 : f32
    %320 = vector.broadcast %cst_115 : f32 to vector<16x128xf32>
    %321 = arith.mulf %320, %319 : vector<16x128xf32>
    %322 = math.tanh %321 : vector<16x128xf32>
    %cst_116 = arith.constant 1.000000e+00 : f32
    %323 = vector.broadcast %cst_116 : f32 to vector<16x128xf32>
    %324 = arith.addf %323, %322 : vector<16x128xf32>
    %325 = arith.mulf %314, %324 : vector<16x128xf32>
    %c768 = arith.constant 768 : index
    %c0_117 = arith.constant 0 : index
    %326 = vector.load %arg1[%c768, %c0_117] : memref<1024x128xbf16, #tpu.memory_space<vmem>>, vector<128x128xbf16>
    %327 = arith.truncf %325 : vector<16x128xf32> to vector<16x128xbf16>
    %cst_118 = arith.constant dense<0.000000e+00> : vector<16x128xf32>
    %328 = tpu.matmul %327, %326, %cst_118 {dimension_numbers = #tpu.dot_dimension_numbers<[1], [0], [0], [1], [0, 0, 1, 1], [], []>} : vector<16x128xbf16>, vector<128x128xbf16>, vector<16x128xf32> -> vector<16x128xf32>
    %329 = vector.broadcast %8 : vector<1x128xf32> to vector<16x128xf32>
    %330 = arith.addf %328, %329 : vector<16x128xf32>
    %331 = arith.addf %307, %330 : vector<16x128xf32>
    %cst_119 = arith.constant dense<0.000000e+00> : vector<16xf32>
    %332 = vector.multi_reduction <add>, %331, %cst_119 [1] : vector<16x128xf32> to vector<16xf32>
    %333 = vector.shape_cast %332 : vector<16xf32> to vector<16x1xf32>
    %cst_120 = arith.constant 3.200000e+01 : f32
    %334 = vector.broadcast %cst_120 : f32 to vector<16x1xf32>
    %335 = arith.divf %333, %334 : vector<16x1xf32>
    %336 = arith.mulf %331, %331 : vector<16x128xf32>
    %cst_121 = arith.constant dense<0.000000e+00> : vector<16xf32>
    %337 = vector.multi_reduction <add>, %336, %cst_121 [1] : vector<16x128xf32> to vector<16xf32>
    %338 = vector.shape_cast %337 : vector<16xf32> to vector<16x1xf32>
    %cst_122 = arith.constant 3.200000e+01 : f32
    %339 = vector.broadcast %cst_122 : f32 to vector<16x1xf32>
    %340 = arith.divf %338, %339 : vector<16x1xf32>
    %341 = arith.mulf %335, %335 : vector<16x1xf32>
    %342 = arith.subf %340, %341 : vector<16x1xf32>
    %343 = vector.broadcast %335 : vector<16x1xf32> to vector<16x128xf32>
    %344 = arith.subf %331, %343 : vector<16x128xf32>
    %cst_123 = arith.constant 9.99999996E-13 : f32
    %345 = vector.broadcast %cst_123 : f32 to vector<16x1xf32>
    %346 = arith.addf %342, %345 : vector<16x1xf32>
    %347 = math.rsqrt %346 : vector<16x1xf32>
    %348 = vector.broadcast %347 : vector<16x1xf32> to vector<16x128xf32>
    %349 = arith.mulf %344, %348 : vector<16x128xf32>
    %350 = vector.broadcast %9 : vector<1x128xf32> to vector<16x128xf32>
    %351 = arith.mulf %349, %350 : vector<16x128xf32>
    %352 = vector.broadcast %10 : vector<1x128xf32> to vector<16x128xf32>
    %353 = arith.addf %351, %352 : vector<16x128xf32>
    %354 = tpu.iota {dimensions = array<i32: 1>} : vector<8x16xi32>
    %355 = tpu.iota {dimensions = array<i32: 0>} : vector<8x16xi32>
    %c8_i32_124 = arith.constant 8 : i32
    %356 = vector.broadcast %c8_i32_124 : i32 to vector<8x16xi32>
    %357 = arith.muli %355, %356 : vector<8x16xi32>
    %358 = arith.cmpi eq, %354, %357 : vector<8x16xi32>
    %359 = arith.extui %358 : vector<8x16xi1> to vector<8x16xi32>
    %360 = arith.sitofp %359 : vector<8x16xi32> to vector<8x16xf32>
    %361 = arith.truncf %360 : vector<8x16xf32> to vector<8x16xbf16>
    %362 = arith.truncf %353 : vector<16x128xf32> to vector<16x128xbf16>
    %cst_125 = arith.constant dense<0.000000e+00> : vector<8x128xf32>
    %363 = tpu.matmul %361, %362, %cst_125 {dimension_numbers = #tpu.dot_dimension_numbers<[1], [0], [0], [1], [0, 0, 1, 1], [], []>} : vector<8x16xbf16>, vector<16x128xbf16>, vector<8x128xf32> -> vector<8x128xf32>
    %c896 = arith.constant 896 : index
    %c0_126 = arith.constant 0 : index
    %364 = vector.load %arg1[%c896, %c0_126] : memref<1024x128xbf16, #tpu.memory_space<vmem>>, vector<128x128xbf16>
    %365 = arith.truncf %363 : vector<8x128xf32> to vector<8x128xbf16>
    %cst_127 = arith.constant dense<0.000000e+00> : vector<8x128xf32>
    %366 = tpu.matmul %365, %364, %cst_127 {dimension_numbers = #tpu.dot_dimension_numbers<[1], [0], [0], [1], [0, 0, 1, 1], [], []>} : vector<8x128xbf16>, vector<128x128xbf16>, vector<8x128xf32> -> vector<8x128xf32>
    %367 = vector.broadcast %11 : vector<1x128xf32> to vector<8x128xf32>
    %368 = arith.addf %366, %367 : vector<8x128xf32>
    %c0_128 = arith.constant 0 : index
    %c0_129 = arith.constant 0 : index
    %369 = vector.load %arg5[%c0_128, %c0_129] : memref<16x128xf32, #tpu.memory_space<vmem>>, vector<8x128xf32>
    tpu.vector_store %arg5[%c0_128, %c0_129], %368 {strides = array<i32>} : memref<16x128xf32, #tpu.memory_space<vmem>>, vector<8x128xf32>,
    %370 = tpu.iota {dimensions = array<i32: 1>} : vector<8x128xi32>
    %c4_i32_130 = arith.constant 4 : i32
    %371 = vector.broadcast %c4_i32_130 : i32 to vector<8x128xi32>
    %372 = arith.cmpi slt, %370, %371 : vector<8x128xi32>
    %cst_131 = arith.constant -1.000000e+09 : f32
    %373 = vector.broadcast %cst_131 : f32 to vector<8x128xf32>
    %374 = arith.select %372, %368, %373 : vector<8x128xi1>, vector<8x128xf32>
    %cst_132 = arith.constant dense<0xFF800000> : vector<8xf32>
    %375 = vector.multi_reduction <maximumf>, %374, %cst_132 [1] : vector<8x128xf32> to vector<8xf32>
    %376 = vector.shape_cast %375 : vector<8xf32> to vector<8x1xf32>
    %377 = vector.broadcast %376 : vector<8x1xf32> to vector<8x128xf32>
    %378 = arith.subf %374, %377 : vector<8x128xf32>
    %379 = math.exp %378 : vector<8x128xf32>
    %cst_133 = arith.constant dense<0.000000e+00> : vector<8xf32>
    %380 = vector.multi_reduction <add>, %379, %cst_133 [1] : vector<8x128xf32> to vector<8xf32>
    %381 = vector.shape_cast %380 : vector<8xf32> to vector<8x1xf32>
    %382 = math.log %381 : vector<8x1xf32>
    %383 = tpu.iota {dimensions = array<i32: 0>} : vector<8x1xi32>
    %c-1_i32 = arith.constant -1 : i32
    %384 = vector.broadcast %c-1_i32 : i32 to vector<8x1xi32>
    %c0_i32_134 = arith.constant 0 : i32
    %385 = vector.broadcast %c0_i32_134 : i32 to vector<8x1xi32>
    %386 = arith.cmpi eq, %383, %385 : vector<8x1xi32>
    %c0_135 = arith.constant 0 : index
    %387 = memref.load %arg4[%c0_135] : memref<2xi32, #tpu.memory_space<smem>>
    %388 = vector.broadcast %387 : i32 to vector<8x1xi32>
    %389 = arith.select %386, %388, %384 : vector<8x1xi1>, vector<8x1xi32>
    %c1_i32_136 = arith.constant 1 : i32
    %390 = vector.broadcast %c1_i32_136 : i32 to vector<8x1xi32>
    %391 = arith.cmpi eq, %383, %390 : vector<8x1xi32>
    %c1_137 = arith.constant 1 : index
    %392 = memref.load %arg4[%c1_137] : memref<2xi32, #tpu.memory_space<smem>>
    %393 = vector.broadcast %392 : i32 to vector<8x1xi32>
    %394 = arith.select %391, %393, %389 : vector<8x1xi1>, vector<8x1xi32>
    %395 = vector.broadcast %394 : vector<8x1xi32> to vector<8x128xi32>
    %396 = arith.cmpi eq, %370, %395 : vector<8x128xi32>
    %397 = arith.extui %396 : vector<8x128xi1> to vector<8x128xi32>
    %398 = arith.sitofp %397 : vector<8x128xi32> to vector<8x128xf32>
    %399 = vector.broadcast %382 : vector<8x1xf32> to vector<8x128xf32>
    %400 = arith.subf %378, %399 : vector<8x128xf32>
    %401 = arith.mulf %398, %400 : vector<8x128xf32>
    %cst_138 = arith.constant dense<0.000000e+00> : vector<8xf32>
    %402 = vector.multi_reduction <add>, %401, %cst_138 [1] : vector<8x128xf32> to vector<8xf32>
    %403 = vector.shape_cast %402 : vector<8xf32> to vector<8x1xf32>
    %cst_139 = arith.constant 0.000000e+00 : f32
    %404 = vector.broadcast %cst_139 : f32 to vector<8x1xf32>
    %405 = arith.subf %404, %403 : vector<8x1xf32>
    %cst_140 = arith.constant dense<0.000000e+00> : vector<1xf32>
    %406 = vector.multi_reduction <add>, %405, %cst_140 [0] : vector<8x1xf32> to vector<1xf32>
    %407 = vector.shape_cast %406 : vector<1xf32> to vector<1x1xf32>
    %cst_141 = arith.constant 5.000000e-01 : f32
    %408 = vector.broadcast %cst_141 : f32 to vector<1x1xf32>
    %409 = arith.mulf %407, %408 : vector<1x1xf32>
    %410 = vector.shape_cast %409 : vector<1x1xf32> to vector<1x1xf32>
    %411 = vector.broadcast %410 : vector<1x1xf32> to vector<8x128xf32>
    %c8 = arith.constant 8 : index
    %c0_142 = arith.constant 0 : index
    %412 = vector.load %arg5[%c8, %c0_142] : memref<16x128xf32, #tpu.memory_space<vmem>>, vector<8x128xf32>
    tpu.vector_store %arg5[%c8, %c0_142], %411 {strides = array<i32>} : memref<16x128xf32, #tpu.memory_space<vmem>>, vector<8x128xf32>,
    return
  }
}

</mosaic_0001>

<bundles_post_ra>
// kernel: custom_model_forward.1
= control target key start
LH: loop header
LB: loop body
LE: loop exit
PB: predicated region body
PF: predicated region fallthrough
CT: control target
= control target key end

     0   :  { %10 = vsyncpa [#allocation3], 0  ;;  %s2250_s0 = inlined_call_operand.vmem [shape: s32[16,1], index: 0, kind: input, shape index: {}]   ;;  %s2251_s1 = inlined_call_operand.hbm [shape: bf16[1024,128], index: 1, kind: input, shape index: {}]   ;;  %s2252_s2 = inlined_call_operand.vmem [shape: f32[16,128], index: 2, kind: input, shape index: {}]   ;;  %s2253_s3 = inlined_call_operand.vmem [shape: s32[2,8], index: 3, kind: input, shape index: {}]   ;;  %s2254_s4 = inlined_call_operand.vmem [shape: s32[2], index: 4, kind: input, shape index: {}]   ;;  %s2255_s5 = inlined_call_operand.vmem [shape: f32[16,128], index: 5, kind: output, shape index: {}]  }
   0x1   :  { %11 = vsyncpa [#allocation4], 0 }
   0x2   :  { %12 = vsyncpa [#allocation7], 0  ;;  %s1951_s18 = smov [#allocation2]   ;;  %s35_s22 = sshll.u32 %s2253_s3, 4  ;;  %s36_s22 = int_to_ptr.vmem [resolvable:$true] %s35_s22 }
   0x3   :  { %s20_s19 = sshll.u32 %s1951_s18, 4  ;;  %s1899_s25 = scalar_lea.hbm %s2251_s1, 8192  ;;  %s21_s19 = int_to_ptr.vmem [resolvable:$true] %s20_s19 }
   0x4   :  { %p1900_p0 = scmp.ne.s32.totalorder %s2251_s1, %s1899_s25  ;;  %p1903_p1 = scmp.lt.u32.totalorder %s1899_s25, %s2251_s1 }
   0x6   :  { %p1905_p2 = pnand %p1903_p1, %p1900_p0 }
   0x8   :  { %1908 = shalt.err (!%p1905_p2)
}
   0x9   :  { %s1909_s30 = scalar_lea.vmem %s21_s19, 8192  ;;  %p1914_p4 = scmp.lt.s32.totalorder %s21_s19, %s21_s19 }
   0xa   :  { %p1910_p3 = scmp.ne.s32.totalorder %s21_s19, %s1909_s30  ;;  %p1915_p5 = scmp.lt.s32.totalorder %s1909_s30, %s1909_s30 }
   0xc   :  { %p1916_p6 = por %p1915_p5, %p1914_p4 }
   0xe   :  { %p1917_p7 = pnand %p1916_p6, %p1910_p3 }
  0x10   :  { %1920 = shalt.err (!%p1917_p7)
}
  0x11   :  { %s1952_s3 = smov 64   ;;  %s1953_s6 = smov 4  }
  0x12   :  { %26 = dma.hbm_to_vmem [thread:$0]  %s2251_s1, 8192, %s21_s19, [#allocation3], %s1952_s3, %s1952_s3, %s1953_s6  }
  0x13   :  { %s1921_s9 = scalar_lea.vmem %s36_s22, 32  ;;  %p1926_p9 = scmp.lt.s32.totalorder %s36_s22, %s36_s22 }
  0x14   :  { %p1922_p8 = scmp.ne.s32.totalorder %s36_s22, %s1921_s9  ;;  %p1927_p10 = scmp.lt.s32.totalorder %s1921_s9, %s1921_s9 }
  0x16   :  { %p1928_p11 = por %p1927_p10, %p1926_p9 }
  0x18   :  { %p1929_p12 = pnand %p1928_p11, %p1922_p8 }
  0x1a   :  { %1932 = shalt.err (!%p1929_p12)
}
  0x1b   :  { %s1954_s10 = smov [#allocation5]   ;;  %s45_s13 = sshll.u32 %s2254_s4, 4  ;;  %s46_s13 = int_to_ptr.vmem [resolvable:$true] %s45_s13 }
  0x1c   :  { %38 = dma.vmem_to_smem %s36_s22, 32, %s1954_s10, [#allocation4]  }
  0x1d   :  { %s1933_s14 = scalar_lea.vmem %s46_s13, 16  ;;  %p1938_p0 = scmp.lt.s32.totalorder %s46_s13, %s46_s13 }
  0x1e   :  { %p1934_p13 = scmp.ne.s32.totalorder %s46_s13, %s1933_s14  ;;  %p1939_p1 = scmp.lt.s32.totalorder %s1933_s14, %s1933_s14 }
  0x20   :  { %p1940_p2 = por %p1939_p1, %p1938_p0 }
  0x22   :  { %p1941_p3 = pnand %p1940_p2, %p1934_p13 }
  0x24   :  { %1944 = shalt.err (!%p1941_p3)
}
  0x25   :  { %s1955_s1 = smov [#allocation6]  }
  0x26   :  { %48 = dma.vmem_to_smem %s46_s13, 16, %s1955_s1, [#allocation7]  }
  0x27   :  { %1945 = dma.done.wait [#allocation3], 8192  }
  0x28   :  { %1946 = vsyncadd [#allocation3], 4294959104 }
  0x29   :  { %1947 = dma.done.wait [#allocation4], 32  }
  0x2a   :  { %1948 = vsyncadd [#allocation4], 4294967264 }
  0x2b   :  { %1949 = dma.done.wait [#allocation7], 16  }
  0x2c   :  { %1950 = vsyncadd [#allocation7], 4294967280 }
  0x2d   :  { %58 = sfence }
  0x2e   :  { %v62_v0 = vld [vmem:[%s2250_s0] sm:$0xff]  ;;  %v1956_v1 = vmov 0   ;;  %v1957_v2 = vmov 0.0   ;;  %v63_v4 = vld [vmem:[%s2250_s0 + $0x8] sm:$0xff]  ;;  %v1813_v6 = vld [vmem:[#allocation2 + $0x10] sm:$0xff]   ;;  %vm1958_vm0 = vmmov 0   ;;  %v64_v19 = vlaneseq }
  0x2f   :  { %1810 = vset.pattern.permute.xlu0 %v1956_v1  ;;  %1623 = vmatprep.subr.bf16.mxu0 %v1957_v2  ;;  %v1811_v3 = vld [vmem:[#allocation2] sm:$0xff]   ;;  %v1812_v5 = vld [vmem:[#allocation2 + $0x8] sm:$0xff]   ;;  %v1814_v8 = vld [vmem:[#allocation2 + $0x18] sm:$0xff]   ;;  %v1959_v24 = vmov 1.0|1.0   ;;  %s517_s19 = sld [smem:[#allocation5]] }
  0x30   :  { %67 = vperm.xlu0 %1810, %v62_v0   ;;  %1643 = vmatprep.subr.bf16.mxu1 %v1957_v2  ;;  %v1819_v7 = vld [vmem:[#allocation2 + $0x40] sm:$0xff]   ;;  %v1821_v9 = vld [vmem:[#allocation2 + $0x48] sm:$0xff]   ;;  %v1823_v11 = vld [vmem:[#allocation2 + $0x50] sm:$0xff]   ;;  %v2036_v21 = vand.u32 127, %v64_v19  ;;  %v2072_v46 = vshrl.u32 %v64_v19, 7  ;;  %s1493_s20 = sld [smem:[#allocation5 + $0x1]] }
  0x31   :  { %1624 = vmatpush3.bf16.msra.mxu0 %v1811_v3  ;;  %1639 = vmatprep.mubr.msk.bf16.mxu0 %vm1958_vm0, %v1957_v2  ;;  %v1815_v10 = vld [vmem:[#allocation2 + $0x20] sm:$0xff]   ;;  %v1816_v12 = vld [vmem:[#allocation2 + $0x28] sm:$0xff]   ;;  %v1825_v13 = vld [vmem:[#allocation2 + $0x58] sm:$0xff]   ;;  %s1500_s21 = sld [smem:[#allocation5 + $0x80]]  ;;  %s1494_s22 = sld [smem:[#allocation5 + $0x2]] }
  0x32   :  { %1625 = vmatprep.subr.bf16.mxu0 %v1957_v2  ;;  %1659 = vmatprep.mubr.msk.bf16.mxu1 %vm1958_vm0, %v1957_v2  ;;  %v1817_v14 = vld [vmem:[#allocation2 + $0x30] sm:$0xff]   ;;  %v1827_v15 = vld [vmem:[#allocation2 + $0x60] sm:$0xff]   ;;  %v1818_v16 = vld [vmem:[#allocation2 + $0x38] sm:$0xff]   ;;  %v203_v47 = vsub.s32 0, %v2072_v46  ;;  %v312_v48 = vsub.s32 1, %v2072_v46  ;;  %v421_v3 = vsub.s32 2, %v2072_v46 }
  0x33   :  { %1644 = vmatpush3.bf16.msra.mxu1 %v1819_v7  ;;  %v1829_v17 = vld [vmem:[#allocation2 + $0x68] sm:$0xff]   ;;  %v1831_v18 = vld [vmem:[#allocation2 + $0x70] sm:$0xff]   ;;  %v1820_v23 = vld [vmem:[#allocation2 + $0x80] sm:$0xff]   ;;  %s1495_s23 = sld [smem:[#allocation5 + $0x3]]  ;;  %s1501_s25 = sld [smem:[#allocation5 + $0x81]]  ;;  %vm521_vm4 = vcmp.eq.s32.totalorder %v2036_v21, 0 }
  0x34   :  { %70 = vperm.xlu0 %1810, %v63_v4   ;;  %1645 = vmatprep.subr.bf16.mxu1 %v1957_v2  ;;  %v1822_v25 = vld [vmem:[#allocation2 + $0x88] sm:$0xff]   ;;  %v1824_v26 = vld [vmem:[#allocation2 + $0x90] sm:$0xff]   ;;  %v1826_v27 = vld [vmem:[#allocation2 + $0x98] sm:$0xff]   ;;  %s2095_s26 = sld [smem:[#allocation5 + $0x4]]  ;;  %s2097_s28 = sld [smem:[#allocation5 + $0x5]]  ;;  %vm621_vm5 = vcmp.eq.s32.totalorder %v2036_v21, 8 }
  0x35   :  { %1626 = vmatpush3.bf16.msra.mxu0 %v1812_v5  ;;  %v1828_v28 = vld [vmem:[#allocation2 + $0xa0] sm:$0xff]   ;;  %v1830_v29 = vld [vmem:[#allocation2 + $0xa8] sm:$0xff]   ;;  %v1832_v30 = vld [vmem:[#allocation2 + $0xb0] sm:$0xff]   ;;  %s518_s24 = ssub.s32 1, %s517_s19  ;;  %s1502_s30 = sld [smem:[#allocation5 + $0x82]]  ;;  %vm537_vm6 = vcmp.eq.s32.totalorder %v2036_v21, 1 }
  0x36   :  { %1627 = vmatprep.subr.bf16.mxu0 %v1957_v2  ;;  %v1833_v31 = vld [vmem:[#allocation2 + $0x78] sm:$0xff]   ;;  %v1835_v36 = vld [vmem:[#allocation2 + $0xc0] sm:$0xff]   ;;  %v1836_v39 = vld [vmem:[#allocation2 + $0xc8] sm:$0xff]   ;;  %s534_s27 = ssub.s32 1, %s1493_s20  ;;  %s519_s29 = scvt.s32.f32 %s518_s24  ;;  %vm637_vm7 = vcmp.eq.s32.totalorder %v2036_v21, 9  ;;  %vm549_vm8 = vcmp.eq.s32.totalorder %v2036_v21, 2 }
  0x37   :  { %1646 = vmatpush3.bf16.msra.mxu1 %v1821_v9  ;;  %v1834_v32 = vld [vmem:[#allocation2 + $0xb8] sm:$0xff]   ;;  %v1837_v40 = vld [vmem:[#allocation2 + $0xd0] sm:$0xff]   ;;  %v1839_v42 = vld [vmem:[#allocation2 + $0xe0] sm:$0xff]   ;;  %s2099_s3 = sld [smem:[#allocation5 + $0x6]]  ;;  %s2101_s6 = sld [smem:[#allocation5 + $0x7]]  ;;  %vm649_vm9 = vcmp.eq.s32.totalorder %v2036_v21, 10 }
  0x38   :  { %1647 = vmatprep.subr.bf16.mxu1 %v1957_v2  ;;  %v1838_v41 = vld [vmem:[#allocation2 + $0xd8] sm:$0xff]   ;;  %v1840_v43 = vld [vmem:[#allocation2 + $0xe8] sm:$0xff]   ;;  %v1841_v44 = vld [vmem:[#allocation2 + $0xf0] sm:$0xff]   ;;  %s2103_s7 = scvt.s32.f32 %s534_s27  ;;  %s618_s8 = ssub.s32 1, %s1500_s21  ;;  %vm561_vm10 = vcmp.eq.s32.totalorder %v2036_v21, 3  ;;  %vm661_vm11 = vcmp.eq.s32.totalorder %v2036_v21, 11 }
  0x39   :  { %1628 = vmatpush3.bf16.msra.mxu0 %v1813_v6  ;;  %v1842_v45 = vld [vmem:[#allocation2 + $0xf8] sm:$0xff]   ;;  %v2079_v49 = vld [vmem:[%s2252_s2] sm:$0xff]  ;;  %s546_s9 = ssub.s32 1, %s1494_s22  ;;  %s1503_s10 = sld [smem:[#allocation5 + $0x83]]  ;;  %vm573_vm12 = vcmp.eq.s32.totalorder %v2036_v21, 4  ;;  %vm673_vm13 = vcmp.eq.s32.totalorder %v2036_v21, 12 }
  0x3a   :  { %1629 = vmatprep.subr.bf16.mxu0 %v1957_v2  ;;  %v204_v50 = vrot.slane %v2079_v49, %v203_v47  ;;  %v313_v51 = vrot.slane %v2079_v49, %v312_v48  ;;  %v422_v4 = vrot.slane %v2079_v49, %v421_v3  ;;  %s520_s11 = smul.f32 -1e+09, %s519_s29  ;;  %s558_s12 = ssub.s32 1, %s1495_s23  ;;  %vm585_vm14 = vcmp.eq.s32.totalorder %v2036_v21, 5 }
  0x3b   :  { %1648 = vmatpush3.bf16.msra.mxu1 %v1823_v11  ;;  %s619_s13 = scvt.s32.f32 %s618_s8  ;;  %s634_s14 = ssub.s32 1, %s1501_s25  ;;  %vm685_vm15 = vcmp.eq.s32.totalorder %v2036_v21, 13 }
  0x3c   :  { %1649 = vmatprep.subr.bf16.mxu1 %v1957_v2  ;;  %s2105_s1 = scvt.s32.f32 %s546_s9  ;;  %s2107_s15 = sld [smem:[#allocation5 + $0x84]] }
  0x3d   :  { %1630 = vmatpush3.bf16.msra.mxu0 %v1814_v8  ;;  %s536_s16 = smul.f32 -1e+09, %s2103_s7  ;;  %s2110_s4 = scvt.s32.f32 %s558_s12 }
  0x3e   :  { %1631 = vmatprep.subr.bf16.mxu0 %v1957_v2  ;;  %s635_s17 = scvt.s32.f32 %s634_s14  ;;  %s646_s0 = ssub.s32 1, %s1502_s30 }
  0x3f   :  { %1650 = vmatpush3.bf16.msra.mxu1 %v1825_v13  ;;  %s620_s18 = smul.f32 -1e+09, %s619_s13  ;;  %s2112_s19 = sld [smem:[#allocation5 + $0x85]] }
  0x40   :  { %1651 = vmatprep.subr.bf16.mxu1 %v1957_v2  ;;  %s548_s20 = smul.f32 -1e+09, %s2105_s1  ;;  %s570_s21 = ssub.s32 1, %s2095_s26 }
  0x41   :  { %1632 = vmatpush3.bf16.msra.mxu0 %v1815_v10  ;;  %s2117_s22 = scvt.s32.f32 %s646_s0  ;;  %s658_s23 = ssub.s32 1, %s1503_s10  ;;  %v630_v13 = vstv %s620_s18 }
  0x42   :  { %1633 = vmatprep.subr.bf16.mxu0 %v1957_v2  ;;  %s636_s24 = smul.f32 -1e+09, %s635_s17  ;;  %s2119_s25 = sld [smem:[#allocation5 + $0x86]]  ;;  %v554_v19 = vstv %s548_s20 }
  0x43   :  { %1652 = vmatpush3.bf16.msra.mxu1 %v1827_v15  ;;  %s2121_s27 = scvt.s32.f32 %s570_s21  ;;  %s582_s29 = ssub.s32 1, %s2097_s28  ;;  %v542_v15 = vstv %s536_s16 }
  0x44   :  { %1653 = vmatprep.subr.bf16.mxu1 %v1957_v2  ;;  %s2126_s26 = scvt.s32.f32 %s658_s23  ;;  %s670_s30 = ssub.s32 1, %s2107_s15 }
  0x45   :  { %1634 = vmatpush3.bf16.msra.mxu0 %v1816_v12  ;;  %v530_v12 = vstv %s520_s11  ;;  %s648_s7 = smul.f32 -1e+09, %s2117_s22  ;;  %s2130_s8 = sld [smem:[#allocation5 + $0x87]] }
  0x46   :  { %1635 = vmatprep.subr.bf16.mxu0 %v1957_v2  ;;  %s560_s9 = smul.f32 -1e+09, %s2110_s4  ;;  %s594_s10 = ssub.s32 1, %s2099_s3 }
  0x47   :  { %1654 = vmatpush3.bf16.msra.mxu1 %v1829_v17  ;;  %v642_v17 = vstv %s636_s24  ;;  %s2136_s28 = scvt.s32.f32 %s670_s30  ;;  %s682_s11 = ssub.s32 1, %s2112_s19 }
  0x48   :  { %1655 = vmatprep.subr.bf16.mxu1 %v1957_v2  ;;  %s2139_s12 = scvt.s32.f32 %s582_s29  ;;  %s660_s13 = smul.f32 -1e+09, %s2126_s26 }
  0x49   :  { %1636 = vmatpush3.bf16.msra.mxu0 %v1817_v14  ;;  %v531_v14 = vsel %vm521_vm4, %v530_v12, -1e+09  ;;  %s572_s14 = smul.f32 -1e+09, %s2121_s27  ;;  %s2143_s3 = scvt.s32.f32 %s594_s10  ;;  %vm709_vm4 = vcmp.eq.s32.totalorder %v2036_v21, 15  ;;  %v1848_v12 = vld [vmem:[#allocation2 + $0x128] sm:$0xff]  }
  0x4a   :  { %1637 = vmatprep.subr.bf16.mxu0 %v1957_v2  ;;  %s683_s1 = scvt.s32.f32 %s682_s11  ;;  %s694_s15 = ssub.s32 1, %s2119_s25 }
  0x4b   :  { %1656 = vmatpush3.bf16.msra.mxu1 %v1831_v18  ;;  %v543_v18 = vsel %vm537_vm6, %v542_v15, %v531_v14  ;;  %s606_s16 = ssub.s32 1, %s2101_s6  ;;  %s672_s4 = smul.f32 -1e+09, %s2136_s28 }
  0x4c   :  { %1657 = vmatprep.subr.bf16.mxu1 %v1957_v2  ;;  %s584_s17 = smul.f32 -1e+09, %s2139_s12  ;;  %s695_s0 = scvt.s32.f32 %s694_s15 }
  0x4d   :  { %1638 = vmatpush3.bf16.msra.mxu0 %v1818_v16  ;;  %v632_v16 = vsel %vm621_vm5, %v630_v13, -1e+09  ;;  %s706_s18 = ssub.s32 1, %s2130_s8  ;;  %s607_s19 = scvt.s32.f32 %s606_s16  ;;  %vm758_vm5 = vcmask 130048   ;;  %v1849_v13 = vld [vmem:[#allocation2 + $0x130] sm:$0xff]  }
  0x4e   :  { %1663 = vmatprep.subr.bf16.mxu0 %v1957_v2  ;;  %s684_s20 = smul.f32 -1e+09, %s683_s1  ;;  %s707_s6 = scvt.s32.f32 %s706_s18 }
  0x4f   :  { %1658 = vmatpush3.bf16.msra.mxu1 %v1833_v31  ;;  %s596_s21 = smul.f32 -1e+09, %s2143_s3  ;;  %s1427_s26 = sld [smem:[#allocation6]] }
  0x50   :  { %1683 = vmatprep.subr.bf16.mxu1 %v1957_v2  ;;  %s696_s22 = smul.f32 -1e+09, %s695_s0  ;;  %s1543_s30 = sld [smem:[#allocation6 + $0x1]] }
  0x51   :  { %s608_s23 = smul.f32 -1e+09, %s607_s19 }
  0x52   :  { %s708_s24 = smul.f32 -1e+09, %s707_s6 }
  0xaf   :  { %v68_v20 = vpop.permute.xlu0 %67 }
  0xb0   :  { %vm72_vm1 = vcmp.eq.s32.totalorder %v2036_v21, %v68_v20  ;;  %v644_v20 = vsel %vm637_vm7, %v642_v17, %v632_v16  ;;  %vm1426_vm7 = vcmp.eq.s32.totalorder %v2072_v46, 0 }
  0xb3   :  { %v71_v22 = vpop.permute.xlu0 %70 }
  0xb4   :  { %vm73_vm2 = vcmp.eq.s32.totalorder %v2036_v21, %v71_v22  ;;  %v654_v22 = vstv %s648_s7 }
  0xb5   :  { %vm1467_vm3 = vmpackc.low %vm73_vm2, %vm72_vm1  ;;  %vm597_vm1 = vcmp.eq.s32.totalorder %v2036_v21, 6  ;;  %vm697_vm2 = vcmp.eq.s32.totalorder %v2036_v21, 14 }
  0xb6   :  { %1640 = vmatmul.mubr.msk.bf16.vlgmr.msra.gmra.mrb[0].mxu0 %vm1467_vm3, %v1959_v24  ;;  %v566_v24 = vstv %s560_s9  ;;  %vm609_vm3 = vcmp.eq.s32.totalorder %v2036_v21, 7 }
  0xb7   :  { %1664 = vmatpush3.bf16.msra.mxu0 %v1820_v23  ;;  %1679 = vmatprep.mubr.msk.bf16.mxu0 %vm1958_vm0, %v1957_v2  ;;  %v555_v23 = vsel %vm549_vm8, %v554_v19, %v543_v18  ;;  %vm1430_vm8 = vcmp.eq.s32.totalorder %v2072_v46, 1 }
  0xb8   :  { %1665 = vmatprep.subr.bf16.mxu0 %v1957_v2 }
  0xbb   :  { %1666 = vmatpush3.bf16.msra.mxu0 %v1822_v25  ;;  %v656_v25 = vsel %vm649_vm9, %v654_v22, %v644_v20  ;;  %v1850_v22 = vld [vmem:[#allocation2 + $0x138] sm:$0xff]  }
  0xbc   :  { %1667 = vmatprep.subr.bf16.mxu0 %v1957_v2 }
  0xbf   :  { %1668 = vmatpush3.bf16.msra.mxu0 %v1824_v26  ;;  %v666_v26 = vstv %s660_s13 }
  0xc0   :  { %1669 = vmatprep.subr.bf16.mxu0 %v1957_v2 }
  0xc3   :  { %1670 = vmatpush3.bf16.msra.mxu0 %v1826_v27  ;;  %v567_v27 = vsel %vm561_vm10, %v566_v24, %v555_v23 }
  0xc4   :  { %1671 = vmatprep.subr.bf16.mxu0 %v1957_v2 }
  0xc7   :  { %1672 = vmatpush3.bf16.msra.mxu0 %v1828_v28  ;;  %v578_v28 = vstv %s572_s14 }
  0xc8   :  { %1673 = vmatprep.subr.bf16.mxu0 %v1957_v2  ;;  %v579_v31 = vsel %vm573_vm12, %v578_v28, %v567_v27  ;;  %v846_v28 = vsub.s32 3, %v2072_v46 }
  0xcb   :  { %1674 = vmatpush3.bf16.msra.mxu0 %v1830_v29  ;;  %v668_v29 = vsel %vm661_vm11, %v666_v26, %v656_v25 }
  0xcc   :  { %1675 = vmatprep.subr.bf16.mxu0 %v1957_v2 }
  0xcf   :  { %1676 = vmatpush3.bf16.msra.mxu0 %v1832_v30  ;;  %v678_v30 = vstv %s672_s4 }
  0xd0   :  { %1677 = vmatprep.subr.bf16.mxu0 %v1957_v2 }
  0xd3   :  { %1678 = vmatpush3.bf16.msra.mxu0 %v1834_v32  ;;  %v590_v32 = vstv %s584_s17 }
  0xd4   :  { %1703 = vmatprep.subr.bf16.mxu0 %v1957_v2 }
 0x189   :  { %v2051_v33 = vpop.f32.mrb[0].mxu0 }
 0x18a   :  { %v1641_v34 = vpop.f32.mrb[1].mxu0 }
 0x18b   :  { %v2053_v35 = vpop.f32.mrb[2].mxu0  ;;  %v680_v34 = vsel %vm673_vm13, %v678_v30, %v668_v29  ;;  %v847_v29 = vrot.slane %v2079_v49, %v846_v28  ;;  %v997_v28 = vsub.s32 6, %v2072_v46 }
 0x18c   :  { %v200_v37 = vpack.c.bf16 %v2053_v35, %v2051_v33  ;;  %v1642_v38 = vpop.f32.mrb[3].mxu0 }
 0x18d   :  { %v602_v38 = vstv %s596_s21 }
 0x18e   :  { %1660 = vmatmul.mubr.bf16.vlgmr.msra.gmra.mrb[0].mxu1 %v200_v37  ;;  %1680 = vmatmul.mubr.bf16.vlgmr.msra.gmra.mrb[4].mxu0 %v200_v37 }
 0x18f   :  { %1684 = vmatpush3.bf16.msra.mxu1 %v1835_v36  ;;  %1699 = vmatprep.mubr.msk.bf16.mxu1 %vm1958_vm0, %v1957_v2  ;;  %v690_v36 = vstv %s684_s20 }
 0x190   :  { %1685 = vmatprep.subr.bf16.mxu1 %v1957_v2  ;;  %1705 = vmatprep.mubr.msk.bf16.mxu0 %vm1958_vm0, %v1957_v2 }
 0x193   :  { %1686 = vmatpush3.bf16.msra.mxu1 %v1836_v39  ;;  %v692_v39 = vsel %vm685_vm15, %v690_v36, %v680_v34 }
 0x194   :  { %1687 = vmatprep.subr.bf16.mxu1 %v1957_v2 }
 0x197   :  { %1688 = vmatpush3.bf16.msra.mxu1 %v1837_v40  ;;  %v702_v40 = vstv %s696_s22 }
 0x198   :  { %1689 = vmatprep.subr.bf16.mxu1 %v1957_v2 }
 0x19b   :  { %1690 = vmatpush3.bf16.msra.mxu1 %v1838_v41 }
 0x19c   :  { %1691 = vmatprep.subr.bf16.mxu1 %v1957_v2 }
 0x19f   :  { %1692 = vmatpush3.bf16.msra.mxu1 %v1839_v42  ;;  %v614_v42 = vstv %s608_s23 }
 0x1a0   :  { %1693 = vmatprep.subr.bf16.mxu1 %v1957_v2 }
 0x1a3   :  { %1694 = vmatpush3.bf16.msra.mxu1 %v1840_v43  ;;  %v704_v43 = vsel %vm697_vm2, %v702_v40, %v692_v39 }
 0x1a4   :  { %1695 = vmatprep.subr.bf16.mxu1 %v1957_v2 }
 0x1a7   :  { %1696 = vmatpush3.bf16.msra.mxu1 %v1841_v44  ;;  %v714_v44 = vstv %s708_s24 }
 0x1a8   :  { %1697 = vmatprep.subr.bf16.mxu1 %v1957_v2 }
 0x1ab   :  { %1698 = vmatpush3.bf16.msra.mxu1 %v1842_v45 }
 0x1ac   :  { %1709 = vmatprep.subr.bf16.mxu1 %v1957_v2 }
 0x1ae   :  { %1700 = vmatmul.mubr.bf16.vlgmr.msra.gmra.mrb[4].mxu1 %v200_v37  ;;  %v591_v37 = vsel %vm585_vm14, %v590_v32, %v579_v31 }
 0x1af   :  { %1711 = vmatprep.mubr.msk.bf16.mxu1 %vm1958_vm0, %v1957_v2  ;;  %v603_v41 = vsel %vm597_vm1, %v602_v38, %v591_v37 }
 0x1b0   :  { %v615_v45 = vsel %vm609_vm3, %v614_v42, %v603_v41  ;;  %v1851_v42 = vld [vmem:[#allocation2 + $0x140] sm:$0xff]  }
 0x261   :  { %v287_v52 = vpop.f32.mrb[0].mxu1  ;;  %v396_v53 = vpop.f32.mrb[4].mxu0 }
 0x262   :  { %v1661_v54 = vpop.f32.mrb[1].mxu1  ;;  %v1681_v55 = vpop.f32.mrb[5].mxu0  ;;  %v288_v58 = vadd.f32 %v287_v52, %v204_v50  ;;  %v397_v59 = vadd.f32 %v396_v53, %v313_v51 }
 0x263   :  { %v290_v56 = vpop.f32.mrb[2].mxu1  ;;  %v399_v57 = vpop.f32.mrb[6].mxu0 }
 0x264   :  { %v291_v60 = vadd.f32 %v290_v56, %v204_v50  ;;  %v400_v61 = vadd.f32 %v399_v57, %v313_v51  ;;  %v1662_v62 = vpop.f32.mrb[3].mxu1  ;;  %v1682_v63 = vpop.f32.mrb[7].mxu0  ;;  %v716_v51 = vsel %vm709_vm4, %v714_v44, %v704_v43  ;;  %v1852_v43 = vld [vmem:[#allocation2 + $0x148] sm:$0xff]   ;;  %v1853_v44 = vld [vmem:[#allocation2 + $0x150] sm:$0xff]  }
 0x266   :  { %v512_v0 = vpack.c.bf16 %v291_v60, %v288_v58  ;;  %v513_v1 = vpack.c.bf16 %v400_v61, %v397_v59 }
 0x268   :  { %1704 = vmatpush3.bf16.xpose.msra.mxu0 %v513_v1 }
 0x269   :  { %1715 = vmatprep.subr.bf16.mxu0 %v1957_v2 }
 0x26f   :  { %1706 = vmatmul.mubr.bf16.vlgmr.msra.gmra.mrb[8].mxu0 %v512_v0 }
 0x270   :  { %1731 = vmatprep.mubr.msk.bf16.mxu0 %vm1958_vm0, %v1957_v2 }
 0x281   :  { %v505_v5 = vpop.f32.mrb[4].mxu1 }
 0x282   :  { %v1701_v6 = vpop.f32.mrb[5].mxu1  ;;  %v506_v8 = vadd.f32 %v505_v5, %v422_v4 }
 0x283   :  { %v508_v7 = vpop.f32.mrb[6].mxu1 }
 0x284   :  { %v509_v9 = vadd.f32 %v508_v7, %v422_v4  ;;  %v1702_v10 = vpop.f32.mrb[7].mxu1  ;;  %v1843_v7 = vld [vmem:[#allocation2 + $0x100] sm:$0xff]  }
 0x285   :  { %1716 = vmatpush3.bf16.msra.mxu0 %v1843_v7  ;;  %v1846_v10 = vld [vmem:[#allocation2 + $0x118] sm:$0xff]  }
 0x286   :  { %v782_v11 = vpack.c.bf16 %v509_v9, %v506_v8  ;;  %v1844_v8 = vld [vmem:[#allocation2 + $0x108] sm:$0xff]   ;;  %1717 = vmatprep.subr.bf16.mxu0 %v1957_v2  ;;  %v1845_v9 = vld [vmem:[#allocation2 + $0x110] sm:$0xff]  }
 0x288   :  { %1710 = vmatpush3.bf16.msra.mxu1 %v782_v11  ;;  %v1847_v11 = vld [vmem:[#allocation2 + $0x120] sm:$0xff]  }
 0x289   :  { %1735 = vmatprep.subr.bf16.mxu1 %v1957_v2  ;;  %1718 = vmatpush3.bf16.msra.mxu0 %v1844_v8 }
 0x28a   :  { %1719 = vmatprep.subr.bf16.mxu0 %v1957_v2 }
 0x28d   :  { %1720 = vmatpush3.bf16.msra.mxu0 %v1845_v9  ;;  %v974_v9 = vsub.s32 5, %v2072_v46 }
 0x28e   :  { %1721 = vmatprep.subr.bf16.mxu0 %v1957_v2 }
 0x291   :  { %1722 = vmatpush3.bf16.msra.mxu0 %v1846_v10 }
 0x292   :  { %1723 = vmatprep.subr.bf16.mxu0 %v1957_v2 }
 0x295   :  { %1724 = vmatpush3.bf16.msra.mxu0 %v1847_v11 }
 0x296   :  { %1725 = vmatprep.subr.bf16.mxu0 %v1957_v2 }
 0x299   :  { %1726 = vmatpush3.bf16.msra.mxu0 %v1848_v12 }
 0x29a   :  { %1727 = vmatprep.subr.bf16.mxu0 %v1957_v2 }
 0x29d   :  { %1728 = vmatpush3.bf16.msra.mxu0 %v1849_v13 }
 0x29e   :  { %1729 = vmatprep.subr.bf16.mxu0 %v1957_v2 }
 0x2a1   :  { %1730 = vmatpush3.bf16.msra.mxu0 %v1850_v22  ;;  %v1861_v22 = vld [vmem:[#allocation2 + $0x190] sm:$0xff]  }
 0x2a2   :  { %1755 = vmatprep.subr.bf16.mxu0 %v1957_v2 }
 0x342   :  { %v751_v50 = vpop.f32.mrb[8].mxu0 }
 0x343   :  { %v752_v52 = vadd.f32 %v751_v50, %v615_v45  ;;  %v1707_v53 = vpop.f32.mrb[9].mxu0  ;;  %v1856_v45 = vld [vmem:[#allocation2 + $0x168] sm:$0xff]   ;;  %v1857_v50 = vld [vmem:[#allocation2 + $0x170] sm:$0xff]  }
 0x344   :  { %v754_v54 = vpop.f32.mrb[10].mxu0 }
 0x345   :  { %v755_v55 = vadd.f32 %v754_v54, %v716_v51  ;;  %v1708_v56 = vpop.f32.mrb[11].mxu0  ;;  %v759_v57 = vsel %vm758_vm5, %v752_v52, -inf  ;;  %v1858_v51 = vld [vmem:[#allocation2 + $0x178] sm:$0xff]  }
 0x346   :  { %760 = vmax.xlane.f32.xlu1 %v759_v57 }
 0x347   :  { %v762_v58 = vsel %vm758_vm5, %v755_v55, -inf }
 0x34a   :  { %763 = vmax.xlane.f32.xlu1 %v762_v58 }
 0x3d3   :  { %v761_v59 = vpop.xlane.xlu1 %760 }
 0x3d4   :  { %v765_v60 = vsub.f32 %v752_v52, %v761_v59 }
 0x3d6   :  { %v767_v61 = vmul.f32 1.442695, %v765_v60 }
 0x3d7   :  { %v764_v62 = vpop.xlane.xlu1 %763 }
 0x3d8   :  { %1875 = vpow2.f32 %v767_v61  ;;  %v766_v63 = vsub.f32 %v755_v55, %v764_v62 }
 0x3da   :  { %v769_v0 = vmul.f32 1.442695, %v766_v63 }
 0x3dc   :  { %1877 = vpow2.f32 %v769_v0 }
 0x3e2   :  { %v1876_v1 = vpop.eup %1875 }
 0x3e3   :  { %v771_v4 = vsel %vm758_vm5, %v1876_v1, 0.0 }
 0x3e4   :  { %772 = vadd.xlane.f32.xlu0 %v771_v4  ;;  %v968_v4 = vsub.s32 4, %v2072_v46 }
 0x3e6   :  { %v1878_v5 = vpop.eup %1877  ;;  %v969_v8 = vrot.slane %v2079_v49, %v968_v4 }
 0x3e7   :  { %v774_v6 = vsel %vm758_vm5, %v1878_v5, 0.0 }
 0x3e8   :  { %775 = vadd.xlane.f32.xlu1 %v774_v6 }
 0x471   :  { %v773_v14 = vpop.xlane.xlu0 %772 }
 0x472   :  { %1879 = vrcp.f32 %v773_v14  ;;  %v975_v14 = vrot.slane %v2079_v49, %v974_v9 }
 0x475   :  { %v776_v15 = vpop.xlane.xlu1 %775 }
 0x476   :  { %1881 = vrcp.f32 %v776_v15 }
 0x47c   :  { %v1880_v16 = vpop.eup %1879 }
 0x47d   :  { %v779_v18 = vmul.f32 %v1880_v16, %v1876_v1 }
 0x480   :  { %v1882_v17 = vpop.eup %1881 }
 0x481   :  { %v780_v19 = vmul.f32 %v1882_v17, %v1878_v5 }
 0x483   :  { %v781_v20 = vpack.c.bf16 %v780_v19, %v779_v18  ;;  %v1859_v19 = vld [vmem:[#allocation2 + $0x180] sm:$0xff]  }
 0x485   :  { %1712 = vmatmul.mubr.msk.bf16.vlgmr.msra.gmra.mrb[8].mxu1 %vm758_vm5, %v781_v20  ;;  %v1860_v20 = vld [vmem:[#allocation2 + $0x188] sm:$0xff]  }
 0x486   :  { %1751 = vmatprep.mubr.msk.bf16.mxu1 %vm1958_vm0, %v1957_v2  ;;  %1736 = vmatpush3.bf16.msra.mxu1 %v1851_v42 }
 0x487   :  { %1737 = vmatprep.subr.bf16.mxu1 %v1957_v2 }
 0x48a   :  { %1738 = vmatpush3.bf16.msra.mxu1 %v1852_v43 }
 0x48b   :  { %1739 = vmatprep.subr.bf16.mxu1 %v1957_v2 }
 0x48e   :  { %1740 = vmatpush3.bf16.msra.mxu1 %v1853_v44 }
 0x48f   :  { %1741 = vmatprep.subr.bf16.mxu1 %v1957_v2 }
 0x558   :  { %v820_v23 = vpop.f32.mrb[8].mxu1 }
 0x559   :  { %v1713_v24 = vpop.f32.mrb[9].mxu1 }
 0x55a   :  { %v823_v25 = vpop.f32.mrb[10].mxu1  ;;  %v1863_v24 = vld [vmem:[#allocation2 + $0x1a0] sm:$0xff]  }
 0x55b   :  { %v843_v26 = vpack.c.bf16 %v823_v25, %v820_v23  ;;  %v1714_v27 = vpop.f32.mrb[11].mxu1  ;;  %v1862_v23 = vld [vmem:[#allocation2 + $0x198] sm:$0xff]   ;;  %v1864_v25 = vld [vmem:[#allocation2 + $0x1a8] sm:$0xff]  }
 0x55c   :  { %v1866_v27 = vld [vmem:[#allocation2 + $0x1b8] sm:$0xff]  }
 0x55d   :  { %1732 = vmatmul.mubr.bf16.vlgmr.msra.gmra.mrb[12].mxu0 %v843_v26  ;;  %v1865_v26 = vld [vmem:[#allocation2 + $0x1b0] sm:$0xff]  }
 0x55e   :  { %1771 = vmatprep.mubr.msk.bf16.mxu0 %vm1958_vm0, %v1957_v2  ;;  %1756 = vmatpush3.bf16.msra.mxu0 %v1859_v19 }
 0x55f   :  { %1757 = vmatprep.subr.bf16.mxu0 %v1957_v2 }
 0x562   :  { %1758 = vmatpush3.bf16.msra.mxu0 %v1860_v20 }
 0x563   :  { %1759 = vmatprep.subr.bf16.mxu0 %v1957_v2 }
 0x566   :  { %1760 = vmatpush3.bf16.msra.mxu0 %v1861_v22 }
 0x567   :  { %1761 = vmatprep.subr.bf16.mxu0 %v1957_v2 }
 0x56a   :  { %1762 = vmatpush3.bf16.msra.mxu0 %v1862_v23  ;;  %v61_v23 = vld [vmem:[%s2252_s2 + $0x8] sm:$0xff] }
 0x56b   :  { %1763 = vmatprep.subr.bf16.mxu0 %v1957_v2 }
 0x56e   :  { %1764 = vmatpush3.bf16.msra.mxu0 %v1863_v24  ;;  %v1247_v24 = vrot.slane %v61_v23, %v203_v47 }
 0x56f   :  { %1765 = vmatprep.subr.bf16.mxu0 %v1957_v2 }
 0x572   :  { %1766 = vmatpush3.bf16.msra.mxu0 %v1864_v25 }
 0x573   :  { %1767 = vmatprep.subr.bf16.mxu0 %v1957_v2 }
 0x576   :  { %1768 = vmatpush3.bf16.msra.mxu0 %v1865_v26 }
 0x577   :  { %1769 = vmatprep.subr.bf16.mxu0 %v1957_v2 }
 0x57a   :  { %1770 = vmatpush3.bf16.msra.mxu0 %v1866_v27  ;;  %v1256_v27 = vmul.u32 8, %v2072_v46 }
 0x57c   :  { %vm1257_vm6 = vcmp.eq.s32.totalorder %v2036_v21, %v1256_v27 }
 0x630   :  { %v930_v30 = vpop.f32.mrb[12].mxu0 }
 0x631   :  { %v931_v31 = vadd.f32 %v930_v30, %v847_v29  ;;  %v1733_v32 = vpop.f32.mrb[13].mxu0 }
 0x632   :  { %v933_v34 = vpop.f32.mrb[14].mxu0 }
 0x633   :  { %v937_v36 = vadd.f32 %v931_v31, %v2051_v33  ;;  %v934_v37 = vadd.f32 %v933_v34, %v847_v29  ;;  %v1734_v38 = vpop.f32.mrb[15].mxu0  ;;  %v1854_v33 = vld [vmem:[#allocation2 + $0x158] sm:$0xff]   ;;  %v998_v29 = vrot.slane %v2079_v49, %v997_v28 }
 0x634   :  { %1742 = vmatpush3.bf16.msra.mxu1 %v1854_v33 }
 0x635   :  { %v938_v39 = vadd.f32 %v934_v37, %v2053_v35  ;;  %939 = vadd.xlane.f32.xlu1 %v937_v36  ;;  %v946_v40 = vmul.f32 %v937_v36, %v937_v36  ;;  %v1855_v35 = vld [vmem:[#allocation2 + $0x160] sm:$0xff]   ;;  %1743 = vmatprep.subr.bf16.mxu1 %v1957_v2 }
 0x637   :  { %v947_v41 = vmul.f32 %v938_v39, %v938_v39 }
 0x638   :  { %1744 = vmatpush3.bf16.msra.mxu1 %v1855_v35 }
 0x639   :  { %941 = vadd.xlane.f32.xlu1 %v938_v39  ;;  %1745 = vmatprep.subr.bf16.mxu1 %v1957_v2 }
 0x63c   :  { %1746 = vmatpush3.bf16.msra.mxu1 %v1856_v45 }
 0x63d   :  { %948 = vadd.xlane.f32.xlu1 %v946_v40  ;;  %1747 = vmatprep.subr.bf16.mxu1 %v1957_v2 }
 0x640   :  { %1748 = vmatpush3.bf16.msra.mxu1 %v1857_v50 }
 0x641   :  { %950 = vadd.xlane.f32.xlu1 %v947_v41  ;;  %1749 = vmatprep.subr.bf16.mxu1 %v1957_v2 }
 0x644   :  { %1750 = vmatpush3.bf16.msra.mxu1 %v1858_v51 }
 0x645   :  { %1775 = vmatprep.subr.bf16.mxu1 %v1957_v2 }
 0x6c2   :  { %v940_v52 = vpop.xlane.xlu1 %939 }
 0x6c3   :  { %v944_v54 = vmul.f32 0.03125, %v940_v52 }
 0x6c5   :  { %v954_v56 = vmul.f32 %v944_v54, %v944_v54  ;;  %v958_v5 = vsub.f32 %v937_v36, %v944_v54 }
 0x6c6   :  { %v942_v53 = vpop.xlane.xlu1 %941 }
 0x6c7   :  { %v945_v57 = vmul.f32 0.03125, %v942_v53 }
 0x6c9   :  { %v955_v61 = vmul.f32 %v945_v57, %v945_v57  ;;  %v959_v10 = vsub.f32 %v938_v39, %v945_v57 }
 0x6ca   :  { %v949_v55 = vpop.xlane.xlu1 %948 }
 0x6cb   :  { %v952_v58 = vmul.f32 0.03125, %v949_v55 }
 0x6cd   :  { %v956_v59 = vsub.f32 %v952_v58, %v954_v56 }
 0x6ce   :  { %v951_v60 = vpop.xlane.xlu1 %950 }
 0x6cf   :  { %v960_v62 = vadd.f32 1e-12, %v956_v59  ;;  %v953_v63 = vmul.f32 0.03125, %v951_v60  ;;  %v1125_v59 = vsub.s32 7, %v2072_v46 }
 0x6d1   :  { %1883 = vrsqrt.f32 %v960_v62  ;;  %v957_v0 = vsub.f32 %v953_v63, %v955_v61  ;;  %v1126_v60 = vrot.slane %v2079_v49, %v1125_v59 }
 0x6d3   :  { %v961_v1 = vadd.f32 1e-12, %v957_v0 }
 0x6d5   :  { %1885 = vrsqrt.f32 %v961_v1 }
 0x6db   :  { %v1884_v6 = vpop.eup %1883 }
 0x6dc   :  { %v964_v7 = vmul.f32 %v1884_v6, %v958_v5 }
 0x6de   :  { %v970_v13 = vmul.f32 %v969_v8, %v964_v7 }
 0x6df   :  { %v1886_v11 = vpop.eup %1885 }
 0x6e0   :  { %v965_v12 = vmul.f32 %v1886_v11, %v959_v10  ;;  %v2195_v16 = vadd.f32 %v975_v14, %v970_v13 }
 0x6e2   :  { %v971_v15 = vmul.f32 %v969_v8, %v965_v12 }
 0x6e4   :  { %v2197_v17 = vadd.f32 %v975_v14, %v971_v15 }
 0x6e6   :  { %v994_v18 = vpack.c.bf16 %v2197_v17, %v2195_v16 }
 0x6e8   :  { %1752 = vmatmul.mubr.bf16.vlgmr.msra.gmra.mrb[12].mxu1 %v994_v18 }
 0x6e9   :  { %1777 = vmatprep.mubr.msk.bf16.mxu1 %vm1958_vm0, %v1957_v2 }
 0x7bb   :  { %v1081_v30 = vpop.f32.mrb[12].mxu1 }
 0x7bc   :  { %v1082_v31 = vadd.f32 %v1081_v30, %v998_v29  ;;  %v1753_v32 = vpop.f32.mrb[13].mxu1 }
 0x7bd   :  { %v1084_v34 = vpop.f32.mrb[14].mxu1 }
 0x7be   :  { %v1090_v36 = vmul.f32 0.044715, %v1082_v31  ;;  %v1085_v37 = vadd.f32 %v1084_v34, %v998_v29  ;;  %v1754_v38 = vpop.f32.mrb[15].mxu1  ;;  %v1088_v53 = vmul.f32 0.5, %v1082_v31 }
 0x7c0   :  { %v1092_v39 = vmul.f32 %v1090_v36, %v1082_v31  ;;  %v1091_v40 = vmul.f32 0.044715, %v1085_v37  ;;  %v1089_v54 = vmul.f32 0.5, %v1085_v37 }
 0x7c2   :  { %v1094_v41 = vmul.f32 %v1092_v39, %v1082_v31  ;;  %v1093_v42 = vmul.f32 %v1091_v40, %v1085_v37  ;;  %v1533_v39 = vsel %vm1257_vm6, 1.0, %v1957_v2 }
 0x7c3   :  { %v1260_v40 = vpack.c.bf16 %v1533_v39, %v1533_v39 }
 0x7c4   :  { %v1096_v43 = vadd.f32 %v1094_v41, %v1082_v31  ;;  %v1095_v44 = vmul.f32 %v1093_v42, %v1085_v37  ;;  %v1253_v31 = vrot.slane %v61_v23, %v312_v48  ;;  %v1867_v41 = vld [vmem:[#allocation2 + $0x1c0] sm:$0xff]   ;;  %v1868_v42 = vld [vmem:[#allocation2 + $0x1c8] sm:$0xff]   ;;  %v1869_v48 = vld [vmem:[#allocation2 + $0x1d0] sm:$0xff]  }
 0x7c6   :  { %v1098_v33 = vmul.f32 0.7978846, %v1096_v43  ;;  %v1097_v35 = vadd.f32 %v1095_v44, %v1085_v37  ;;  %v1870_v43 = vld [vmem:[#allocation2 + $0x1d8] sm:$0xff]   ;;  %v1871_v44 = vld [vmem:[#allocation2 + $0x1e0] sm:$0xff]  }
 0x7c8   :  { %1887 = vtanh.f32 %v1098_v33  ;;  %v1099_v45 = vmul.f32 0.7978846, %v1097_v35  ;;  %v1872_v33 = vld [vmem:[#allocation2 + $0x1e8] sm:$0xff]   ;;  %v1873_v35 = vld [vmem:[#allocation2 + $0x1f0] sm:$0xff]  }
 0x7ca   :  { %1889 = vtanh.f32 %v1099_v45  ;;  %v1874_v45 = vld [vmem:[#allocation2 + $0x1f8] sm:$0xff]  }
 0x7d2   :  { %v1888_v50 = vpop.eup %1887 }
 0x7d3   :  { %v1102_v51 = vadd.f32 1.0, %v1888_v50 }
 0x7d4   :  { %v1890_v52 = vpop.eup %1889 }
 0x7d5   :  { %v1103_v55 = vadd.f32 1.0, %v1890_v52  ;;  %v1104_v56 = vmul.f32 %v1102_v51, %v1088_v53 }
 0x7d7   :  { %v1105_v57 = vmul.f32 %v1103_v55, %v1089_v54  ;;  %v1325_v55 = vrot.slane %v61_v23, %v421_v3 }
 0x7d9   :  { %v1122_v58 = vpack.c.bf16 %v1105_v57, %v1104_v56 }
 0x7db   :  { %1772 = vmatmul.mubr.bf16.vlgmr.msra.gmra.mrb[16].mxu0 %v1122_v58 }
 0x8ae   :  { %v1209_v61 = vpop.f32.mrb[16].mxu0 }
 0x8af   :  { %v1210_v62 = vadd.f32 %v1209_v61, %v1126_v60  ;;  %v1773_v63 = vpop.f32.mrb[17].mxu0 }
 0x8b0   :  { %v1212_v0 = vpop.f32.mrb[18].mxu0 }
 0x8b1   :  { %v1216_v1 = vadd.f32 %v1210_v62, %v2195_v16  ;;  %v1213_v4 = vadd.f32 %v1212_v0, %v1126_v60  ;;  %v1774_v5 = vpop.f32.mrb[19].mxu0 }
 0x8b3   :  { %v1217_v6 = vadd.f32 %v1213_v4, %v2197_v17  ;;  %1218 = vadd.xlane.f32.xlu1 %v1216_v1  ;;  %v1224_v8 = vmul.f32 %v1216_v1, %v1216_v1  ;;  %v1428_v4 = vstv %s1427_s26 }
 0x8b4   :  { %v1429_v5 = vsel %vm1426_vm7, %v1428_v4, 4294967295 }
 0x8b5   :  { %v1225_v7 = vmul.f32 %v1217_v6, %v1217_v6 }
 0x8b7   :  { %1220 = vadd.xlane.f32.xlu1 %v1217_v6  ;;  %1228 = vadd.xlane.f32.xlu0 %v1225_v7 }
 0x8bb   :  { %1226 = vadd.xlane.f32.xlu1 %v1224_v8 }
 0x940   :  { %v1219_v9 = vpop.xlane.xlu1 %1218 }
 0x941   :  { %v1222_v49 = vmul.f32 0.03125, %v1219_v9 }
 0x943   :  { %v1232_v18 = vmul.f32 %v1222_v49, %v1222_v49  ;;  %v1236_v28 = vsub.f32 %v1216_v1, %v1222_v49 }
 0x944   :  { %v1221_v10 = vpop.xlane.xlu1 %1220  ;;  %v1229_v11 = vpop.xlane.xlu0 %1228 }
 0x945   :  { %v1223_v12 = vmul.f32 0.03125, %v1221_v10  ;;  %v1231_v14 = vmul.f32 0.03125, %v1229_v11 }
 0x947   :  { %v1233_v13 = vmul.f32 %v1223_v12, %v1223_v12  ;;  %v1237_v25 = vsub.f32 %v1217_v6, %v1223_v12  ;;  %v1432_v6 = vstv %s1543_s30 }
 0x948   :  { %v1227_v15 = vpop.xlane.xlu1 %1226  ;;  %v1433_v7 = vsel %vm1430_vm8, %v1432_v6, %v1429_v5 }
 0x949   :  { %v1235_v16 = vsub.f32 %v1231_v14, %v1233_v13  ;;  %v1230_v19 = vmul.f32 0.03125, %v1227_v15  ;;  %vm1434_vm9 = vcmp.eq.s32.totalorder %v2036_v21, %v1433_v7 }
 0x94a   :  { %v1544_v10 = vsel %vm1434_vm9, 1.0, %v1957_v2 }
 0x94b   :  { %v1239_v20 = vadd.f32 1e-12, %v1235_v16  ;;  %v1234_v22 = vsub.f32 %v1230_v19, %v1232_v18 }
 0x94d   :  { %1891 = vrsqrt.f32 %v1239_v20  ;;  %v1238_v17 = vadd.f32 1e-12, %v1234_v22 }
 0x94f   :  { %1893 = vrsqrt.f32 %v1238_v17 }
 0x957   :  { %v1892_v26 = vpop.eup %1891 }
 0x958   :  { %v1243_v29 = vmul.f32 %v1892_v26, %v1237_v25 }
 0x959   :  { %v1894_v30 = vpop.eup %1893 }
 0x95a   :  { %v1242_v32 = vmul.f32 %v1894_v30, %v1236_v28  ;;  %v1249_v34 = vmul.f32 %v1247_v24, %v1243_v29 }
 0x95c   :  { %v1248_v36 = vmul.f32 %v1247_v24, %v1242_v32  ;;  %v1255_v38 = vadd.f32 %v1253_v31, %v1249_v34 }
 0x95e   :  { %v1254_v37 = vadd.f32 %v1253_v31, %v1248_v36 }
 0x960   :  { %v1261_v47 = vpack.c.bf16 %v1255_v38, %v1254_v37 }
 0x962   :  { %1776 = vmatpush3.bf16.msra.mxu1 %v1261_v47 }
 0x963   :  { %1781 = vmatprep.subr.bf16.mxu1 %v1957_v2 }
 0x965   :  { %1778 = vmatmul.mubr.msk.bf16.vlgmr.msra.gmra.mrb[16].mxu1 %vm758_vm5, %v1260_v40 }
 0x966   :  { %1782 = vmatpush3.bf16.msra.mxu1 %v1867_v41  ;;  %1797 = vmatprep.mubr.msk.bf16.mxu1 %vm1958_vm0, %v1957_v2  ;;  %vm1415_vm0 = vcmp.lt.s32.totalorder %v2036_v21, 4 }
 0x967   :  { %1783 = vmatprep.subr.bf16.mxu1 %v1957_v2 }
 0x96a   :  { %1784 = vmatpush3.bf16.msra.mxu1 %v1868_v42 }
 0x96b   :  { %1785 = vmatprep.subr.bf16.mxu1 %v1957_v2 }
 0x96e   :  { %1786 = vmatpush3.bf16.msra.mxu1 %v1869_v48 }
 0x96f   :  { %1787 = vmatprep.subr.bf16.mxu1 %v1957_v2 }
 0x972   :  { %1788 = vmatpush3.bf16.msra.mxu1 %v1870_v43 }
 0x973   :  { %1789 = vmatprep.subr.bf16.mxu1 %v1957_v2 }
 0x976   :  { %1790 = vmatpush3.bf16.msra.mxu1 %v1871_v44 }
 0x977   :  { %1791 = vmatprep.subr.bf16.mxu1 %v1957_v2 }
 0x97a   :  { %1792 = vmatpush3.bf16.msra.mxu1 %v1872_v33 }
 0x97b   :  { %1793 = vmatprep.subr.bf16.mxu1 %v1957_v2 }
 0x97e   :  { %1794 = vmatpush3.bf16.msra.mxu1 %v1873_v35 }
 0x97f   :  { %1795 = vmatprep.subr.bf16.mxu1 %v1957_v2 }
 0x982   :  { %1796 = vmatpush3.bf16.msra.mxu1 %v1874_v45 }
 0xa38   :  { %v1299_v50 = vpop.f32.mrb[16].mxu1 }
 0xa39   :  { %v1321_v51 = vpack.c.bf16 %v1299_v50, %v1299_v50  ;;  %v1779_v52 = vpop.f32.mrb[17].mxu1 }
 0xa3a   :  { %v1302_v53 = vpop.f32.mrb[18].mxu1 }
 0xa3b   :  { %1798 = vmatmul.mubr.bf16.vlgmr.msra.gmra.mrb[20].mxu1 %v1321_v51  ;;  %v1780_v54 = vpop.f32.mrb[19].mxu1 }
 0xb0e   :  { %v1408_v56 = vpop.f32.mrb[20].mxu1 }
 0xb0f   :  { %v1409_v57 = vadd.f32 %v1408_v56, %v1325_v55  ;;  %v1799_v58 = vpop.f32.mrb[21].mxu1 }
 0xb10   :  { %v1411_v59 = vpop.f32.mrb[22].mxu1 }
 0xb11   :  { %1414 = vst [vmem:[%s2255_s5] sm:$0xff] %v1409_v57  ;;  %v1416_v60 = vsel %vm1415_vm0, %v1409_v57, -1e+09  ;;  %v1800_v61 = vpop.f32.mrb[23].mxu1 }
 0xb12   :  { %1417 = vmax.xlane.f32.xlu1 %v1416_v60 }
 0xb9f   :  { %v1418_v62 = vpop.xlane.xlu1 %1417 }
 0xba0   :  { %v1419_v63 = vsub.f32 %v1416_v60, %v1418_v62 }
 0xba2   :  { %v1420_v0 = vmul.f32 1.442695, %v1419_v63 }
 0xba4   :  { %1895 = vpow2.f32 %v1420_v0 }
 0xbae   :  { %v1896_v1 = vpop.eup %1895 }
 0xbaf   :  { %1422 = vadd.xlane.f32.xlu0 %v1896_v1 }
 0xc3c   :  { %v1423_v3 = vpop.xlane.xlu0 %1422 }
 0xc3d   :  { %1897 = vlog2.f32 %v1423_v3 }
 0xc47   :  { %v1898_v8 = vpop.eup %1897 }
 0xc48   :  { %v1425_v9 = vmul.f32 0.6931472, %v1898_v8 }
 0xc4a   :  { %v1437_v11 = vsub.f32 %v1419_v63, %v1425_v9 }
 0xc4c   :  { %v1438_v49 = vmul.f32 %v1544_v10, %v1437_v11 }
 0xc4e   :  { %1439 = vadd.xlane.f32.xlu1 %v1438_v49 }
 0xcdb   :  { %v1440_v12 = vpop.xlane.xlu1 %1439 }
 0xcdc   :  { %v1441_v13 = vsub.f32 0.0, %v1440_v12 }
 0xcde   :  { %v1442_v14 = vrot.slane %v1441_v13, 4 }
 0xce0   :  { %v1443_v15 = vadd.f32 %v1442_v14, %v1441_v13 }
 0xce2   :  { %v1444_v18 = vrot.slane %v1443_v15, 2 }
 0xce4   :  { %v1445_v16 = vadd.f32 %v1444_v18, %v1443_v15 }
 0xce6   :  { %v1446_v19 = vrot.slane %v1445_v16, 1 }
 0xce8   :  { %v1447_v20 = vadd.f32 %v1446_v19, %v1445_v16 }
 0xcea   :  { %v1448_v46 = vmul.f32 0.5, %v1447_v20 }
 0xcec   :  { %1449 = vst [vmem:[%s2255_s5 + $0x8] sm:$0xff] %v1448_v46 }
 0xced   :  { %1454 = vsyncpa [#allocation3], 1 }
 0xcee   :  { %1455 = vsyncpa [#allocation4], 1 }
 0xcef   :  { %1456 = vsyncpa [#allocation7], 1 }

</bundles_post_ra>
